<compile_context>
chip_gen: v5e
topology: v5e:2x2
jax: 0.10.0
libtpu: 0.0.40
codegen_flags: <defaults>
</compile_context>

<pallas_src>
import math

import jax
import jax.numpy as jnp
from jax.experimental import pallas as pl
from jax.experimental.pallas import tpu as pltpu

_HIGHEST = jax.lax.Precision.HIGHEST

# VMEM budget (bytes) for the double-buffered x/out blocks of one grid step and
# the scoped-VMEM limit requested from Mosaic.  18 MiB of blocks keeps ample
# headroom under 32 MiB on every generation (v5e 16 MiB default is raised, v7x
# 64 MiB physical is respected) while each step still moves ~6 MiB of x.
_VMEM_BLOCK_BUDGET = 18 * 1024 * 1024
_VMEM_LIMIT_BYTES = 32 * 1024 * 1024


def _round_up(x, m):
    return (x + m - 1) // m * m


# ----------------------------------------------------------------------------
# Kernels
# ----------------------------------------------------------------------------
def _packed_kernel(x_ref, w_ref, b_ref, shuf_ref, o_ref):
    # x_ref:    (TR, pack*d_x)            lane-dense packed rows
    # w_ref:    (pack*d_x, pack*H)        block-diagonal fused weight
    # b_ref:    (1, pack*H)               tiled fused bias
    # shuf_ref: (log2(H), pack*H, pack*H) lane-permutation matrices (l <-> l^d)
    z = jnp.dot(x_ref[...], w_ref[...],
                preferred_element_type=jnp.float32, precision=_HIGHEST)
    z = z + b_ref[...]

    # nn.functional.relu(y) in the reference is non-in-place and its result is
    # discarded -> no-op (this is what makes the two-linear fusion exact).

    # Numerically stable softmax over each group of `num_heads` adjacent lanes
    # (one group == one original row).  Butterfly all-reduce within the group;
    # the lane exchange is a matmul with a 0/1 permutation matrix.
    n_steps = shuf_ref.shape[0]
    m = z
    for s in range(n_steps):
        perm = jnp.dot(m, shuf_ref[s],
                       preferred_element_type=jnp.float32, precision=_HIGHEST)
        m = jnp.maximum(m, perm)
    e = jnp.exp(z - m)
    acc = e
    for s in range(n_steps):
        perm = jnp.dot(acc, shuf_ref[s],
                       preferred_element_type=jnp.float32, precision=_HIGHEST)
        acc = acc + perm
    o_ref[...] = (e / acc).astype(o_ref.dtype)


def _simple_kernel(x_ref, w_ref, b_ref, o_ref):
    # Fallback (unpacked) path: natural (TR, d_x) @ (d_x, H) + softmax(axis=-1).
    z = jnp.dot(x_ref[...], w_ref[...],
                preferred_element_type=jnp.float32, precision=_HIGHEST)
    z = z + b_ref[...]
    z = z - jnp.max(z, axis=-1, keepdims=True)
    e = jnp.exp(z)
    o_ref[...] = (e / jnp.sum(e, axis=-1, keepdims=True)).astype(o_ref.dtype)


# ----------------------------------------------------------------------------
# Wrappers
# ----------------------------------------------------------------------------
def _choose_pack(d_x, num_heads):
    """Original rows per packed slab row, or None if packing does not apply."""
    if num_heads < 2 or (num_heads & (num_heads - 1)) != 0:
        return None                      # butterfly needs a power-of-two group
    pack = 128 // math.gcd(128, d_x)     # minimal pack making x lane-dense
    if pack > 16:
        return None                      # block-diag matmul would inflate too much
    while pack < 8:                      # denser output slab, fewer packed rows
        pack *= 2
    return pack


def _run_packed(x, w_fused, b_fused, pack, out_dtype):
    N, d_x = x.shape
    num_heads = w_fused.shape[1]
    lanes_in = pack * d_x                # multiple of 128 -> x lane-dense
    lanes_out = pack * num_heads

    # (N, d_x) <-> (N/pack, pack*d_x) and (N, H) <-> (N/pack, pack*H) are free
    # row-major reshapes (identical HBM bytes).  Zero-pad N to a pack multiple.
    n_pad = _round_up(N, pack)
    if n_pad != N:
        x = jnp.pad(x, ((0, n_pad - N), (0, 0)))
    rows = n_pad // pack
    x_packed = x.reshape(rows, lanes_in).astype(jnp.float32)

    # Block-diagonal fused weight + tiled bias: same (d_x -> H) map applied
    # independently to each of the `pack` rows sharing a slab row.
    w_bd = jnp.kron(jnp.eye(pack, dtype=jnp.float32), w_fused)   # (lanes_in, lanes_out)
    b_bd = jnp.tile(b_fused, pack).reshape(1, lanes_out)

    # Lane-permutation matrices (l -> l XOR d) for the in-group butterfly.
    n_steps = num_heads.bit_length() - 1
    idx = jnp.arange(lanes_out, dtype=jnp.int32)
    shuf = jnp.stack([
        (idx[:, None] == (idx[None, :] ^ (1 << s))).astype(jnp.float32)
        for s in range(n_steps)])                                 # (n_steps, L, L)

    # Row tile from the VMEM budget: x block is lane-dense, out block pads its
    # lanes_out lanes up to 128; both are double-buffered by the pipeline.
    bytes_per_row = 4 * (lanes_in + _round_up(lanes_out, 128)) * 2
    tile_rows = max(8, (_VMEM_BLOCK_BUDGET // bytes_per_row) // 8 * 8)
    tile_rows = min(tile_rows, rows)
    grid = (pl.cdiv(rows, tile_rows),)

    out_packed = pl.pallas_call(
        _packed_kernel,
        out_shape=jax.ShapeDtypeStruct((rows, lanes_out), out_dtype),
        grid_spec=pltpu.PrefetchScalarGridSpec(
            num_scalar_prefetch=0,
            grid=grid,
            in_specs=[
                pl.BlockSpec((tile_rows, lanes_in), lambda i: (i, 0)),
                pl.BlockSpec((lanes_in, lanes_out), lambda i: (0, 0)),
                pl.BlockSpec((1, lanes_out), lambda i: (0, 0)),
                pl.BlockSpec((n_steps, lanes_out, lanes_out),
                             lambda i: (0, 0, 0)),
            ],
            out_specs=pl.BlockSpec((tile_rows, lanes_out), lambda i: (i, 0)),
        ),
        compiler_params=pltpu.CompilerParams(
            dimension_semantics=("parallel",),      # both TCs on v7x
            vmem_limit_bytes=_VMEM_LIMIT_BYTES,
        ),
        cost_estimate=pl.CostEstimate(
            flops=2 * rows * lanes_in * lanes_out,
            transcendentals=n_pad * num_heads,
            bytes_accessed=4 * n_pad * (d_x + num_heads),
        ),
    )(x_packed, w_bd, b_bd, shuf)

    out = out_packed.reshape(n_pad, num_heads)
    return out[:N] if n_pad != N else out


def _run_simple(x, w_fused, b_fused, out_dtype):
    N, d_x = x.shape
    num_heads = w_fused.shape[1]
    x = x.astype(jnp.float32)
    b_row = b_fused.reshape(1, num_heads)

    bytes_per_row = 4 * (_round_up(d_x, 128) + _round_up(num_heads, 128)) * 2
    tile_n = max(8, (_VMEM_BLOCK_BUDGET // bytes_per_row) // 8 * 8)
    tile_n = min(tile_n, N)
    grid = (pl.cdiv(N, tile_n),)

    return pl.pallas_call(
        _simple_kernel,
        out_shape=jax.ShapeDtypeStruct((N, num_heads), out_dtype),
        grid_spec=pltpu.PrefetchScalarGridSpec(
            num_scalar_prefetch=0,
            grid=grid,
            in_specs=[
                pl.BlockSpec((tile_n, d_x), lambda i: (i, 0)),
                pl.BlockSpec((d_x, num_heads), lambda i: (0, 0)),
                pl.BlockSpec((1, num_heads), lambda i: (0, 0)),
            ],
            out_specs=pl.BlockSpec((tile_n, num_heads), lambda i: (i, 0)),
        ),
        compiler_params=pltpu.CompilerParams(
            dimension_semantics=("parallel",),
            vmem_limit_bytes=_VMEM_LIMIT_BYTES,
        ),
        cost_estimate=pl.CostEstimate(
            flops=2 * N * d_x * num_heads,
            transcendentals=N * num_heads,
            bytes_accessed=4 * N * (d_x + num_heads),
        ),
    )(x, w_fused, b_row)


def simple_multihead_attention(x, w1, b1, w2, b2):
    """Forward of SimpleMultiheadAttention.

    x: (N, d_x); w1: (d_attn, d_x); b1: (d_attn,); w2: (num_heads, d_attn);
    b2: (num_heads,)  -- PyTorch nn.Linear (out, in) layout.
    Returns (N, num_heads); each row is a softmax distribution.
    """
    # The reference ReLU is a no-op, so the two Linears compose exactly into
    # one affine map: z = x @ (W2 @ W1)^T + (W2 @ b1 + b2).
    w_fused = jnp.einsum("ad,ha->dh", w1, w2,
                         precision=_HIGHEST).astype(jnp.float32)   # (d_x, H)
    b_fused = (jnp.dot(w2, b1, precision=_HIGHEST) + b2).astype(jnp.float32)

    pack = _choose_pack(x.shape[1], w2.shape[0])
    if pack is None:
        return _run_simple(x, w_fused, b_fused, x.dtype)
    return _run_packed(x, w_fused, b_fused, pack, x.dtype)


# ----------------------------------------------------------------------------
# Reference + self-test
# ----------------------------------------------------------------------------
def _reference(x, w1, b1, w2, b2):
    y = jnp.dot(x, w1.T, precision=_HIGHEST) + b1
    # relu(y) in the PyTorch module is not in-place and unused -> no-op.
    z = jnp.dot(y, w2.T, precision=_HIGHEST) + b2
    z = z - jnp.max(z, axis=-1, keepdims=True)
    e = jnp.exp(z)
    return e / jnp.sum(e, axis=-1, keepdims=True)


def _make_params(key, d_x, d_attn, num_heads):
    k1, k2, k3, k4 = jax.random.split(key, 4)
    bound1 = 1.0 / math.sqrt(d_x)
    bound2 = 1.0 / math.sqrt(d_attn)
    w1 = jax.random.uniform(k1, (d_attn, d_x), jnp.float32, -bound1, bound1)
    b1 = jax.random.uniform(k2, (d_attn,), jnp.float32, -bound1, bound1)
    w2 = jax.random.uniform(k3, (num_heads, d_attn), jnp.float32, -bound2, bound2)
    b2 = jax.random.uniform(k4, (num_heads,), jnp.float32, -bound2, bound2)
    return w1, b1, w2, b2


if __name__ == "__main__":
    key = jax.random.PRNGKey(0)

    # Shapes implied by the module (packed / lane-dense path); N not a
    # multiple of the pack factor to exercise the padding logic.
    N, d_x, d_attn, num_heads = 300, 32, 16, 4
    kx, kp = jax.random.split(key)
    x = jax.random.normal(kx, (N, d_x), dtype=jnp.float32)
    w1, b1, w2, b2 = _make_params(kp, d_x, d_attn, num_heads)

    out = jax.block_until_ready(simple_multihead_attention(x, w1, b1, w2, b2))
    ref = _reference(x, w1, b1, w2, b2)
    assert out.shape == (N, num_heads)
    assert jnp.allclose(out, ref, atol=2e-3, rtol=2e-3), \
        float(jnp.max(jnp.abs(out - ref)))
    assert jnp.allclose(jnp.sum(out, axis=-1), jnp.ones((N,)), atol=1e-3)

    # Odd shapes exercise the unpacked fallback path.
    N2, d_x2, d_attn2, num_heads2 = 17, 10, 6, 3
    kx2, kp2 = jax.random.split(kp)
    x2 = jax.random.normal(kx2, (N2, d_x2), dtype=jnp.float32)
    p2 = _make_params(kp2, d_x2, d_attn2, num_heads2)
    out2 = jax.block_until_ready(simple_multihead_attention(x2, *p2))
    ref2 = _reference(x2, *p2)
    assert out2.shape == (N2, num_heads2)
    assert jnp.allclose(out2, ref2, atol=2e-3, rtol=2e-3)
    assert jnp.allclose(jnp.sum(out2, axis=-1), jnp.ones((N2,)), atol=1e-3)

    print("KERNEL_OK")
</pallas_src>

<mosaic_0001>
module attributes {stable_mosaic.version = 11 : i64} {
  func.func @_packed_kernel(%arg0: i32, %arg1: memref<38x256xf32, #tpu.memory_space<vmem>>, %arg2: memref<256x32xf32, #tpu.memory_space<vmem>>, %arg3: memref<1x32xf32, #tpu.memory_space<vmem>>, %arg4: memref<2x32x32xf32, #tpu.memory_space<vmem>>, %arg5: memref<38x32xf32, #tpu.memory_space<vmem>>) attributes {dimension_semantics = [#tpu.dimension_semantics<parallel>], iteration_bounds = array<i64: 1>, scalar_prefetch = 0 : i64, scratch_operands = 0 : i64, tpu.core_type = #tpu.core_type<tc>, window_params = [{transform_indices = @transform_0, window_bounds = array<i64: 38, 256>}, {pipeline_mode = #tpu.pipeline_mode<synchronous>, transform_indices = @transform_1, window_bounds = array<i64: 256, 32>}, {pipeline_mode = #tpu.pipeline_mode<synchronous>, transform_indices = @transform_2, window_bounds = array<i64: 1, 32>}, {pipeline_mode = #tpu.pipeline_mode<synchronous>, transform_indices = @transform_3, window_bounds = array<i64: 2, 32, 32>}, {transform_indices = @transform_4, window_bounds = array<i64: 38, 32>}]} {
    %c0 = arith.constant 0 : index
    %c0_0 = arith.constant 0 : index
    %0 = vector.load %arg1[%c0, %c0_0] : memref<38x256xf32, #tpu.memory_space<vmem>>, vector<38x256xf32>
    %c0_1 = arith.constant 0 : index
    %c0_2 = arith.constant 0 : index
    %1 = vector.load %arg2[%c0_1, %c0_2] : memref<256x32xf32, #tpu.memory_space<vmem>>, vector<256x32xf32>
    %cst = arith.constant dense<0.000000e+00> : vector<38x32xf32>
    %2 = tpu.matmul %0, %1, %cst {dimension_numbers = #tpu.dot_dimension_numbers<[1], [0], [0], [1], [0, 0, 1, 1], [], []>, precision = #tpu.contract_precision<fp32>} : vector<38x256xf32>, vector<256x32xf32>, vector<38x32xf32> -> vector<38x32xf32>
    %c0_3 = arith.constant 0 : index
    %c0_4 = arith.constant 0 : index
    %3 = vector.load %arg3[%c0_3, %c0_4] : memref<1x32xf32, #tpu.memory_space<vmem>>, vector<1x32xf32>
    %4 = vector.broadcast %3 : vector<1x32xf32> to vector<38x32xf32>
    %5 = arith.addf %2, %4 : vector<38x32xf32>
    %c0_5 = arith.constant 0 : index
    %c0_6 = arith.constant 0 : index
    %c0_7 = arith.constant 0 : index
    %6 = vector.load %arg4[%c0_5, %c0_6, %c0_7] : memref<2x32x32xf32, #tpu.memory_space<vmem>>, vector<1x32x32xf32>
    %7 = vector.shape_cast %6 : vector<1x32x32xf32> to vector<32x32xf32>
    %cst_8 = arith.constant dense<0.000000e+00> : vector<38x32xf32>
    %8 = tpu.matmul %5, %7, %cst_8 {dimension_numbers = #tpu.dot_dimension_numbers<[1], [0], [0], [1], [0, 0, 1, 1], [], []>, precision = #tpu.contract_precision<fp32>} : vector<38x32xf32>, vector<32x32xf32>, vector<38x32xf32> -> vector<38x32xf32>
    %9 = arith.maximumf %5, %8 : vector<38x32xf32>
    %c1 = arith.constant 1 : index
    %c0_9 = arith.constant 0 : index
    %c0_10 = arith.constant 0 : index
    %10 = vector.load %arg4[%c1, %c0_9, %c0_10] : memref<2x32x32xf32, #tpu.memory_space<vmem>>, vector<1x32x32xf32>
    %11 = vector.shape_cast %10 : vector<1x32x32xf32> to vector<32x32xf32>
    %cst_11 = arith.constant dense<0.000000e+00> : vector<38x32xf32>
    %12 = tpu.matmul %9, %11, %cst_11 {dimension_numbers = #tpu.dot_dimension_numbers<[1], [0], [0], [1], [0, 0, 1, 1], [], []>, precision = #tpu.contract_precision<fp32>} : vector<38x32xf32>, vector<32x32xf32>, vector<38x32xf32> -> vector<38x32xf32>
    %13 = arith.maximumf %9, %12 : vector<38x32xf32>
    %14 = arith.subf %5, %13 : vector<38x32xf32>
    %15 = math.exp %14 : vector<38x32xf32>
    %c0_12 = arith.constant 0 : index
    %c0_13 = arith.constant 0 : index
    %c0_14 = arith.constant 0 : index
    %16 = vector.load %arg4[%c0_12, %c0_13, %c0_14] : memref<2x32x32xf32, #tpu.memory_space<vmem>>, vector<1x32x32xf32>
    %17 = vector.shape_cast %16 : vector<1x32x32xf32> to vector<32x32xf32>
    %cst_15 = arith.constant dense<0.000000e+00> : vector<38x32xf32>
    %18 = tpu.matmul %15, %17, %cst_15 {dimension_numbers = #tpu.dot_dimension_numbers<[1], [0], [0], [1], [0, 0, 1, 1], [], []>, precision = #tpu.contract_precision<fp32>} : vector<38x32xf32>, vector<32x32xf32>, vector<38x32xf32> -> vector<38x32xf32>
    %19 = arith.addf %15, %18 : vector<38x32xf32>
    %c1_16 = arith.constant 1 : index
    %c0_17 = arith.constant 0 : index
    %c0_18 = arith.constant 0 : index
    %20 = vector.load %arg4[%c1_16, %c0_17, %c0_18] : memref<2x32x32xf32, #tpu.memory_space<vmem>>, vector<1x32x32xf32>
    %21 = vector.shape_cast %20 : vector<1x32x32xf32> to vector<32x32xf32>
    %cst_19 = arith.constant dense<0.000000e+00> : vector<38x32xf32>
    %22 = tpu.matmul %19, %21, %cst_19 {dimension_numbers = #tpu.dot_dimension_numbers<[1], [0], [0], [1], [0, 0, 1, 1], [], []>, precision = #tpu.contract_precision<fp32>} : vector<38x32xf32>, vector<32x32xf32>, vector<38x32xf32> -> vector<38x32xf32>
    %23 = arith.addf %19, %22 : vector<38x32xf32>
    %24 = arith.divf %15, %23 : vector<38x32xf32>
    %c0_20 = arith.constant 0 : index
    %c0_21 = arith.constant 0 : index
    %25 = vector.load %arg5[%c0_20, %c0_21] : memref<38x32xf32, #tpu.memory_space<vmem>>, vector<38x32xf32>
    tpu.vector_store %arg5[%c0_20, %c0_21], %24 {strides = array<i32>} : memref<38x32xf32, #tpu.memory_space<vmem>>, vector<38x32xf32>,
    return
  }
  func.func @transform_0(%arg0: i32) -> (i32, i32) {
    %c0_i32 = arith.constant 0 : i32
    %c0_i32_0 = arith.constant 0 : i32
    return %arg0, %c0_i32 : i32, i32
  }
  func.func @transform_1(%arg0: i32) -> (i32, i32) {
    %c0_i32 = arith.constant 0 : i32
    %c0_i32_0 = arith.constant 0 : i32
    %c0_i32_1 = arith.constant 0 : i32
    return %c0_i32, %c0_i32_0 : i32, i32
  }
  func.func @transform_2(%arg0: i32) -> (i32, i32) {
    %c0_i32 = arith.constant 0 : i32
    %c0_i32_0 = arith.constant 0 : i32
    %c0_i32_1 = arith.constant 0 : i32
    return %c0_i32, %c0_i32_0 : i32, i32
  }
  func.func @transform_3(%arg0: i32) -> (i32, i32, i32) {
    %c0_i32 = arith.constant 0 : i32
    %c0_i32_0 = arith.constant 0 : i32
    %c0_i32_1 = arith.constant 0 : i32
    %c0_i32_2 = arith.constant 0 : i32
    return %c0_i32, %c0_i32_0, %c0_i32_1 : i32, i32, i32
  }
  func.func @transform_4(%arg0: i32) -> (i32, i32) {
    %c0_i32 = arith.constant 0 : i32
    %c0_i32_0 = arith.constant 0 : i32
    return %arg0, %c0_i32 : i32, i32
  }
}

</mosaic_0001>

<bundles_post_ra>
// kernel: tpu_custom_call.1
= control target key start
LH: loop header
LB: loop body
LE: loop exit
PB: predicated region body
PF: predicated region fallthrough
CT: control target
= control target key end

     0   :  { %vm997_vm0 = vcmask 261120   ;;  %s3738_s1 = inlined_call_operand.vmem [shape: f32[256,32], index: 1, kind: input, shape index: {}]   ;;  %s3739_s0 = inlined_call_operand.vmem [shape: f32[38,256], index: 0, kind: input, shape index: {}]   ;;  %s3740_s2 = inlined_call_operand.vmem [shape: f32[1,32], index: 2, kind: input, shape index: {}]   ;;  %s3741_s3 = inlined_call_operand.vmem [shape: f32[2,32,32], index: 3, kind: input, shape index: {}]   ;;  %s3742_s4 = inlined_call_operand.vmem [shape: f32[38,32], index: 4, kind: output, shape index: {}]  }
   0x1   :  { %v42_v0 = vld [vmem:[%s3738_s1 + $0x78] sm:$0xff]  ;;  %v41_v1 = vld [vmem:[%s3738_s1 + $0x70] sm:$0xff]  ;;  %v40_v2 = vld [vmem:[%s3738_s1 + $0x68] sm:$0xff] }
   0x2   :  { %v2478_v3 = vand.u32 4294901760, %v42_v0  ;;  %v2480_v4 = vand.u32 4294901760, %v41_v1  ;;  %v2482_v5 = vand.u32 4294901760, %v40_v2  ;;  %v39_v6 = vld [vmem:[%s3738_s1 + $0x60] sm:$0xff]  ;;  %v38_v7 = vld [vmem:[%s3738_s1 + $0x58] sm:$0xff]  ;;  %v37_v8 = vld [vmem:[%s3738_s1 + $0x50] sm:$0xff] }
   0x3   :  { %v2493_v9 = vand.u32 4294901760, %v39_v6  ;;  %v2495_v10 = vand.u32 4294901760, %v38_v7  ;;  %v2497_v11 = vand.u32 4294901760, %v37_v8  ;;  %v36_v12 = vld [vmem:[%s3738_s1 + $0x48] sm:$0xff]  ;;  %v35_v13 = vld [vmem:[%s3738_s1 + $0x40] sm:$0xff]  ;;  %v34_v18 = vld [vmem:[%s3738_s1 + $0x38] sm:$0xff] }
   0x4   :  { %64 = vmatpush.msra.mxu0 %v2478_v3  ;;  %v2507_v14 = vsub.f32 %v42_v0, %v2478_v3  ;;  %v2510_v15 = vsub.f32 %v41_v1, %v2480_v4  ;;  %328 = vmatpush.msra.mxu3 %v2478_v3  ;;  %v2514_v16 = vsub.f32 %v40_v2, %v2482_v5  ;;  %v2516_v17 = vand.u32 4294901760, %v36_v12  ;;  %v33_v26 = vld [vmem:[%s3738_s1 + $0x30] sm:$0xff]  ;;  %v32_v36 = vld [vmem:[%s3738_s1 + $0x28] sm:$0xff]  ;;  %v31_v43 = vld [vmem:[%s3738_s1 + $0x20] sm:$0xff] }
   0x5   :  { %v2522_v19 = vsub.f32 %v39_v6, %v2493_v9  ;;  %v2525_v20 = vsub.f32 %v38_v7, %v2495_v10  ;;  %v2527_v21 = vand.u32 4294901760, %v35_v13  ;;  %v2535_v25 = vsub.f32 %v37_v8, %v2497_v11  ;;  %v30_v49 = vld [vmem:[%s3738_s1 + $0x18] sm:$0xff]  ;;  %v29_v55 = vld [vmem:[%s3738_s1 + $0x10] sm:$0xff]  ;;  %v17_v56 = vld [vmem:[%s3739_s0] sm:$0xff] }
   0x6   :  { %66 = vmatpush.msra.mxu0 %v2480_v4  ;;  %255 = vmatpush.msra.mxu2 %v2507_v14  ;;  %v3756_v22 = vand.u32 4294901760, %v2507_v14  ;;  %v3755_v23 = vand.u32 4294901760, %v2510_v15  ;;  %v3753_v24 = vand.u32 4294901760, %v2514_v16  ;;  %v2542_v28 = vand.u32 4294901760, %v34_v18  ;;  %v28_v60 = vld [vmem:[%s3738_s1 + $0x8] sm:$0xff]  ;;  %v58_v63 = vld [vmem:[%s3738_s1 + $0xf8] sm:$0xff] }
   0x7   :  { %330 = vmatpush.msra.mxu3 %v2480_v4  ;;  %v3752_v27 = vand.u32 4294901760, %v2522_v19  ;;  %v2545_v29 = vsub.f32 %v36_v12, %v2516_v17  ;;  %v3751_v33 = vand.u32 4294901760, %v2525_v20  ;;  %v2560_v34 = vand.u32 4294901760, %v33_v26 }
   0x8   :  { %68 = vmatpush.msra.mxu0 %v2482_v5  ;;  %258 = vmatpush.msra.mxu2 %v2510_v15  ;;  %v139_v30 = vsub.f32 %v2507_v14, %v3756_v22  ;;  %v145_v31 = vsub.f32 %v2510_v15, %v3755_v23  ;;  %v151_v32 = vsub.f32 %v2514_v16, %v3753_v24  ;;  %v3750_v40 = vand.u32 4294901760, %v2535_v25 }
   0x9   :  { %332 = vmatpush.msra.mxu3 %v2482_v5  ;;  %v2563_v35 = vsub.f32 %v35_v13, %v2527_v21  ;;  %v157_v39 = vsub.f32 %v2522_v19, %v3752_v27  ;;  %v3749_v41 = vand.u32 4294901760, %v2545_v29  ;;  %v2577_v42 = vsub.f32 %v34_v18, %v2542_v28  ;;  %v27_v13 = vld [vmem:[%s3738_s1] sm:$0xff]  ;;  %v57_v18 = vld [vmem:[%s3738_s1 + $0xf0] sm:$0xff] }
   0xa   :  { %70 = vmatpush.msra.mxu0 %v2493_v9  ;;  %v140_v37 = vand.u32 4294901760, %v139_v30  ;;  %261 = vmatpush.msra.mxu2 %v2514_v16  ;;  %v146_v38 = vand.u32 4294901760, %v145_v31  ;;  %v152_v44 = vand.u32 4294901760, %v151_v32  ;;  %v163_v45 = vsub.f32 %v2525_v20, %v3751_v33 }
   0xb   :  { %334 = vmatpush.msra.mxu3 %v2493_v9  ;;  %v2586_v46 = vand.u32 4294901760, %v32_v36  ;;  %v3747_v47 = vand.u32 4294901760, %v2563_v35  ;;  %v2592_v48 = vsub.f32 %v33_v26, %v2560_v34  ;;  %v158_v50 = vand.u32 4294901760, %v157_v39 }
   0xc   :  { %72 = vmatpush.msra.mxu0 %v2495_v10  ;;  %141 = vmatpush.msra.mxu1 %v140_v37  ;;  %v169_v51 = vsub.f32 %v2535_v25, %v3750_v40  ;;  %v2601_v52 = vand.u32 4294901760, %v31_v43  ;;  %v175_v53 = vsub.f32 %v2545_v29, %v3749_v41  ;;  %v3746_v54 = vand.u32 4294901760, %v2577_v42 }
   0xd   :  { %264 = vmatpush.msra.mxu2 %v2522_v19  ;;  %336 = vmatpush.msra.mxu3 %v2495_v10  ;;  %v164_v57 = vand.u32 4294901760, %v163_v45  ;;  %v2616_v58 = vand.u32 4294901760, %v30_v49  ;;  %v2619_v59 = vsub.f32 %v32_v36, %v2586_v46  ;;  %v181_v61 = vsub.f32 %v2563_v35, %v3747_v47  ;;  %v19_v36 = vld [vmem:[%s3739_s0 + $0x10] sm:$0xff]  ;;  %v21_v47 = vld [vmem:[%s3739_s0 + $0x20] sm:$0xff] }
   0xe   :  { %74 = vmatpush.msra.mxu0 %v2497_v11  ;;  %147 = vmatpush.msra.mxu1 %v146_v38  ;;  %v3745_v62 = vand.u32 4294901760, %v2592_v48  ;;  %v170_v0 = vand.u32 4294901760, %v169_v51  ;;  %v2634_v1 = vand.u32 4294901760, %v29_v55  ;;  %v2637_v2 = vsub.f32 %v31_v43, %v2601_v52 }
   0xf   :  { %267 = vmatpush.msra.mxu2 %v2525_v20  ;;  %338 = vmatpush.msra.mxu3 %v2497_v11  ;;  %v2639_v6 = vand.u32 4294901760, %v17_v56  ;;  %v176_v7 = vand.u32 4294901760, %v175_v53  ;;  %v187_v8 = vsub.f32 %v2577_v42, %v3746_v54  ;;  %v2646_v12 = vand.u32 4294901760, %v28_v60 }
  0x10   :  { %76 = vmatpush.msra.mxu0 %v2516_v17  ;;  %153 = vmatpush.msra.mxu1 %v152_v44  ;;  %v3743_v26 = vand.u32 4294901760, %v2619_v59  ;;  %v2657_v30 = vsub.f32 %v30_v49, %v2616_v58  ;;  %v2662_v32 = vand.u32 4294901760, %v58_v63  ;;  %v182_v37 = vand.u32 4294901760, %v181_v61  ;;  %v56_v49 = vld [vmem:[%s3738_s1 + $0xe8] sm:$0xff] }
  0x11   :  { %270 = vmatpush.msra.mxu2 %v2535_v25  ;;  %340 = vmatpush.msra.mxu3 %v2516_v17  ;;  %3777 = vst [vmem:[#allocation2_spill] sm:$0xff] %v2646_v12  ;;  %v2660_v31 = vsub.f32 %v17_v56, %v2639_v6  ;;  %v193_v38 = vsub.f32 %v2592_v48, %v3745_v62  ;;  %v2673_v39 = vand.u32 4294901760, %v27_v13  ;;  %v3744_v43 = vand.u32 4294901760, %v2637_v2 }
  0x12   :  { %78 = vmatpush.msra.mxu0 %v2527_v21  ;;  %159 = vmatpush.msra.mxu1 %v158_v50  ;;  %v2677_v44 = vsub.f32 %v29_v55, %v2634_v1  ;;  %v2679_v45 = vand.u32 4294901760, %v57_v18  ;;  %v188_v50 = vand.u32 4294901760, %v187_v8  ;;  %v2687_v53 = vand.u32 4294901760, %v19_v36 }
  0x13   :  { %273 = vmatpush.msra.mxu2 %v2545_v29  ;;  %342 = vmatpush.msra.mxu3 %v2527_v21  ;;  %3778 = vst [vmem:[#allocation3_spill] sm:$0xff] %v2673_v39  ;;  %v3757_v51 = vand.u32 4294901760, %v2660_v31  ;;  %v199_v55 = vsub.f32 %v2619_v59, %v3743_v26  ;;  %v3748_v56 = vand.u32 4294901760, %v2657_v30  ;;  %v2698_v61 = vsub.f32 %v58_v63, %v2662_v32 }
  0x14   :  { %80 = vmatpush.msra.mxu0 %v2542_v28  ;;  %165 = vmatpush.msra.mxu1 %v164_v57  ;;  %v2695_v57 = vsub.f32 %v28_v60, %v2646_v12  ;;  %v2702_v8 = vand.u32 4294901760, %v56_v49  ;;  %v3754_v60 = vand.u32 4294901760, %v2677_v44  ;;  %v2710_v26 = vsub.f32 %v27_v13, %v2673_v39 }
  0x15   :  { %276 = vmatpush.msra.mxu2 %v2563_v35  ;;  %344 = vmatpush.msra.mxu3 %v2542_v28  ;;  %v2713_v63 = vsub.f32 %v57_v18, %v2679_v45  ;;  %v200_v13 = vand.u32 4294901760, %v199_v55  ;;  %v211_v18 = vsub.f32 %v2657_v30, %v3748_v56  ;;  %v3758_v54 = vand.u32 4294901760, %v2698_v61  ;;  %v54_v55 = vld [vmem:[%s3738_s1 + $0xd8] sm:$0xff] }
  0x16   :  { %82 = vmatpush.msra.mxu0 %v2560_v34  ;;  %171 = vmatpush.msra.mxu1 %v170_v0  ;;  %v194_v0 = vand.u32 4294901760, %v193_v38  ;;  %v55_v38 = vld [vmem:[%s3738_s1 + $0xe0] sm:$0xff]  ;;  %v3759_v62 = vand.u32 4294901760, %v2695_v57  ;;  %v217_v41 = vsub.f32 %v2677_v44, %v3754_v60  ;;  %v3760_v40 = vand.u32 4294901760, %v2710_v26 }
  0x17   :  { %279 = vmatpush.msra.mxu2 %v2577_v42  ;;  %346 = vmatpush.msra.mxu3 %v2560_v34  ;;  %3779 = vst [vmem:[#allocation4_spill] sm:$0xff] %v2713_v63  ;;  %v3762_v33 = vand.u32 4294901760, %v2713_v63  ;;  %v2754_v24 = vand.u32 4294901760, %v21_v47  ;;  %v2766_v23 = vand.u32 4294901760, %v54_v55 }
  0x18   :  { %84 = vmatpush.msra.mxu0 %v2586_v46  ;;  %177 = vmatpush.msra.mxu1 %v176_v7  ;;  %v205_v7 = vsub.f32 %v2637_v2, %v3744_v43  ;;  %v2724_v43 = vsub.f32 %v19_v36, %v2687_v53  ;;  %v2738_v36 = vsub.f32 %v56_v49, %v2702_v8 }
  0x19   :  { %282 = vmatpush.msra.mxu2 %v2592_v48  ;;  %348 = vmatpush.msra.mxu3 %v2586_v46  ;;  %v223_v60 = vsub.f32 %v2695_v57, %v3759_v62  ;;  %v610_v62 = vsub.f32 %v2713_v63, %v3762_v33 }
  0x1a   :  { %86 = vmatpush.msra.mxu0 %v2601_v52  ;;  %183 = vmatpush.msra.mxu1 %v182_v37  ;;  %v98_v37 = vsub.f32 %v2660_v31, %v3757_v51  ;;  %3780 = vst [vmem:[#allocation5_spill] sm:$0xff] %v2738_v36  ;;  %v206_v56 = vand.u32 4294901760, %v205_v7  ;;  %v3763_v27 = vand.u32 4294901760, %v2724_v43  ;;  %v212_v7 = vand.u32 4294901760, %v211_v18 }
  0x1b   :  { %285 = vmatpush.msra.mxu2 %v2619_v59  ;;  %350 = vmatpush.msra.mxu3 %v2601_v52  ;;  %v218_v18 = vand.u32 4294901760, %v217_v41  ;;  %v224_v41 = vand.u32 4294901760, %v223_v60  ;;  %v611_v63 = vand.u32 4294901760, %v610_v62 }
  0x1c   :  { %88 = vmatpush.msra.mxu0 %v2616_v58  ;;  %189 = vmatpush.msra.mxu1 %v188_v50  ;;  %v2740_v50 = vand.u32 4294901760, %v55_v38  ;;  %v99_v49 = vand.u32 4294901760, %v98_v37  ;;  %v604_v37 = vsub.f32 %v2698_v61, %v3758_v54  ;;  %v229_v54 = vsub.f32 %v2710_v26, %v3760_v40 }
  0x1d   :  { %288 = vmatpush.msra.mxu2 %v2637_v2  ;;  %352 = vmatpush.msra.mxu3 %v2616_v58 }
  0x1e   :  { %90 = vmatpush.msra.mxu0 %v2634_v1  ;;  %195 = vmatpush.msra.mxu1 %v194_v0  ;;  %v53_v0 = vld [vmem:[%s3738_s1 + $0xd0] sm:$0xff]  ;;  %v2772_v51 = vsub.f32 %v55_v38, %v2740_v50  ;;  %v106_v38 = vsub.f32 %v2724_v43, %v3763_v27  ;;  %v605_v40 = vand.u32 4294901760, %v604_v37  ;;  %v3781_v27 = vand.u32 4294901760, %v2660_v31 }
  0x1f   :  { %291 = vmatpush.msra.mxu2 %v2657_v30  ;;  %354 = vmatpush.msra.mxu3 %v2634_v1  ;;  %v2784_v22 = vand.u32 4294901760, %v53_v0  ;;  %v230_v37 = vand.u32 4294901760, %v229_v54 }
  0x20   :  { %92 = vmatpush.msra.mxu0 %v2646_v12  ;;  %201 = vmatpush.msra.mxu1 %v200_v13  ;;  %v52_v13 = vld [vmem:[%s3738_s1 + $0xc8] sm:$0xff] }
  0x21   :  { %294 = vmatpush.msra.mxu2 %v2677_v44  ;;  %356 = vmatpush.msra.mxu3 %v2646_v12  ;;  %v2795_v12 = vsub.f32 %v54_v55, %v2766_v23  ;;  %v2797_v33 = vand.u32 4294901760, %v52_v13  ;;  %v51_v55 = vld [vmem:[%s3738_s1 + $0xc0] sm:$0xff] }
  0x22   :  { %94 = vmatpush.msra.mxu0 %v2673_v39  ;;  %207 = vmatpush.msra.mxu1 %v206_v56  ;;  %v2791_v56 = vsub.f32 %v21_v47, %v2754_v24  ;;  %v3782_v47 = vand.u32 4294901760, %v2738_v36 }
  0x23   :  { %100 = vmatmul.f32.vlgmr.msra.gmra.mxu0 %v99_v49  ;;  %297 = vmatpush.msra.mxu2 %v2695_v57  ;;  %v23_v49 = vld [vmem:[%s3739_s0 + $0x30] sm:$0xff]  ;;  %v3769_v54 = vand.u32 4294901760, %v2795_v12  ;;  %v2827_v62 = vsub.f32 %v52_v13, %v2797_v33 }
  0x24   :  { %213 = vmatpush.msra.mxu1 %v212_v7  ;;  %358 = vmatpush.msra.mxu3 %v2673_v39  ;;  %v616_v60 = vsub.f32 %v2738_v36, %v3782_v47  ;;  %v2814_v39 = vsub.f32 %v53_v0, %v2784_v22  ;;  %v107_v47 = vand.u32 4294901760, %v106_v38  ;;  %v3770_v7 = vand.u32 4294901760, %v2791_v56  ;;  %v49_v13 = vld [vmem:[%s3738_s1 + $0xb0] sm:$0xff] }
  0x25   :  { %300 = vmatpush.msra.mxu2 %v2710_v26  ;;  %362 = vmatmul.f32.vlgmr.msra.gmra.mxu3 %v3781_v27  ;;  %v3783_v27 = vand.u32 4294901760, %v2507_v14  ;;  %v2820_v36 = vand.u32 4294901760, %v23_v49  ;;  %v3784_v14 = vand.u32 4294901760, %v2510_v15  ;;  %v3785_v38 = vand.u32 4294901760, %v2772_v51 }
  0x26   :  { %219 = vmatpush.msra.mxu1 %v218_v18  ;;  %303 = vmatmul.f32.vlgmr.msra.gmra.mxu2 %v2660_v31  ;;  %v50_v18 = vld [vmem:[%s3738_s1 + $0xb8] sm:$0xff]  ;;  %v2829_v31 = vand.u32 4294901760, %v51_v55  ;;  %v617_v0 = vand.u32 4294901760, %v616_v60  ;;  %v114_v15 = vsub.f32 %v2791_v56, %v3770_v7 }
  0x27   :  { %529 = vmatpush.msrb.mxu2 %v2662_v32  ;;  %393 = vmatpush.msrb.mxu0 %v3783_v27  ;;  %v622_v27 = vsub.f32 %v2772_v51, %v3785_v38  ;;  %v2848_v60 = vsub.f32 %v23_v49, %v2820_v36  ;;  %v3786_v49 = vand.u32 4294901760, %v2514_v16  ;;  %v2864_v38 = vand.u32 4294901760, %v49_v13 }
  0x28   :  { %225 = vmatpush.msra.mxu1 %v224_v41  ;;  %606 = vmatpush.msrb.mxu3 %v605_v40  ;;  %v3771_v40 = vand.u32 4294901760, %v2814_v39  ;;  %v2838_v41 = vand.u32 4294901760, %v50_v18  ;;  %v3787_v16 = vand.u32 4294901760, %v2724_v43 }
  0x29   :  { %531 = vmatpush.msrb.mxu2 %v2679_v45  ;;  %397 = vmatpush.msrb.mxu0 %v3784_v14  ;;  %v48_v14 = vld [vmem:[%s3738_s1 + $0xa8] sm:$0xff] }
  0x2a   :  { %231 = vmatpush.msra.mxu1 %v230_v37  ;;  %612 = vmatpush.msrb.mxu3 %v611_v63  ;;  %v628_v63 = vsub.f32 %v2795_v12, %v3769_v54  ;;  %v3772_v37 = vand.u32 4294901760, %v2827_v62  ;;  %v25_v54 = vld [vmem:[%s3739_s0 + $0x40] sm:$0x3f]  ;;  %v2875_v7 = vsub.f32 %v50_v18, %v2838_v41 }
  0x2b   :  { %108 = vmatmul.f32.gmra.mxu0 %v107_v47  ;;  %233 = vmatmul.f32.vlgmr.msra.gmra.mxu1 %v2639_v6  ;;  %v2857_v47 = vsub.f32 %v51_v55, %v2829_v31  ;;  %v634_v55 = vsub.f32 %v2814_v39, %v3771_v40  ;;  %v3788_v40 = vand.u32 4294901760, %v2522_v19 }
  0x2c   :  { %476 = vmatpush.msrb.mxu1 %v2478_v3  ;;  %533 = vmatpush.msrb.mxu2 %v2702_v8  ;;  %v623_v3 = vand.u32 4294901760, %v622_v27  ;;  %v629_v18 = vand.u32 4294901760, %v628_v63  ;;  %v2897_v27 = vsub.f32 %v49_v13, %v2864_v38  ;;  %v3790_v13 = vand.u32 4294901760, %v2848_v60 }
  0x2d   :  { %401 = vmatpush.msrb.mxu0 %v3786_v49  ;;  %618 = vmatpush.msrb.mxu3 %v617_v0  ;;  %v115_v0 = vand.u32 4294901760, %v114_v15  ;;  %v2881_v49 = vand.u32 4294901760, %v48_v14  ;;  %v3773_v15 = vand.u32 4294901760, %v2857_v47  ;;  %v635_v19 = vand.u32 4294901760, %v634_v55 }
  0x2e   :  { %478 = vmatpush.msrb.mxu1 %v2480_v4  ;;  %308 = vmatmul.f32.gmra.mxu2 %v2724_v43  ;;  %v47_v4 = vld [vmem:[%s3738_s1 + $0xa0] sm:$0xff]  ;;  %v640_v43 = vsub.f32 %v2827_v62, %v3772_v37  ;;  %v46_v37 = vld [vmem:[%s3738_s1 + $0x98] sm:$0xff] }
  0x2f   :  { %535 = vmatpush.msrb.mxu2 %v2740_v50  ;;  %368 = vmatmul.f32.gmra.mxu3 %v3787_v16  ;;  %v2893_v16 = vand.u32 4294901760, %v25_v54  ;;  %v2903_v63 = vand.u32 4294901760, %v47_v4  ;;  %v646_v55 = vsub.f32 %v2857_v47, %v3773_v15  ;;  %v44_v15 = vld [vmem:[%s3738_s1 + $0x88] sm:$0xff] }
  0x30   :  { %480 = vmatpush.msrb.mxu1 %v2482_v5  ;;  %405 = vmatpush.msrb.mxu0 %v3788_v40  ;;  %v3789_v5 = vand.u32 4294901760, %v2525_v20  ;;  %v3774_v40 = vand.u32 4294901760, %v2875_v7  ;;  %v2913_v20 = vsub.f32 %v48_v14, %v2881_v49  ;;  %v2926_v14 = vand.u32 4294901760, %v46_v37 }
  0x31   :  { %537 = vmatpush.msrb.mxu2 %v2766_v23  ;;  %624 = vmatpush.msrb.mxu3 %v623_v3  ;;  %v122_v3 = vsub.f32 %v2848_v60, %v3790_v13  ;;  %v3793_v13 = vand.u32 4294901760, %v2791_v56 }
  0x32   :  { %409 = vmatpush.msrb.mxu0 %v3789_v5  ;;  %482 = vmatpush.msrb.mxu1 %v2493_v9  ;;  %v641_v9 = vand.u32 4294901760, %v640_v43  ;;  %v2920_v5 = vsub.f32 %v25_v54, %v2893_v16  ;;  %v652_v54 = vsub.f32 %v2875_v7, %v3774_v40 }
  0x33   :  { %116 = vmatmul.f32.gmra.mxu0 %v115_v0  ;;  %237 = vmatmul.f32.gmra.mxu1 %v2687_v53  ;;  %v3791_v0 = vand.u32 4294901760, %v2535_v25  ;;  %v3792_v25 = vand.u32 4294901760, %v2545_v29  ;;  %v123_v43 = vand.u32 4294901760, %v122_v3  ;;  %v3794_v29 = vand.u32 4294901760, %v2897_v27 }
  0x34   :  { %630 = vmatpush.msrb.mxu3 %v629_v18  ;;  %539 = vmatpush.msrb.mxu2 %v2784_v22  ;;  %v45_v18 = vld [vmem:[%s3738_s1 + $0x90] sm:$0xff]  ;;  %v3776_v40 = vand.u32 4294901760, %v2920_v5 }
  0x35   :  { %484 = vmatpush.msrb.mxu1 %v2495_v10  ;;  %413 = vmatpush.msrb.mxu0 %v3791_v0  ;;  %v2936_v10 = vsub.f32 %v47_v4, %v2903_v63  ;;  %v3775_v0 = vand.u32 4294901760, %v2913_v20  ;;  %v2947_v4 = vand.u32 4294901760, %v45_v18  ;;  %v658_v3 = vsub.f32 %v2897_v27, %v3794_v29  ;;  %v43_v29 = vld [vmem:[%s3738_s1 + $0x80] sm:$0xff] }
  0x36   :  { %541 = vmatpush.msrb.mxu2 %v2797_v33  ;;  %636 = vmatpush.msrb.mxu3 %v635_v19  ;;  %v647_v19 = vand.u32 4294901760, %v646_v55  ;;  %v2987_v55 = vand.u32 4294901760, %v43_v29 }
  0x37   :  { %313 = vmatmul.f32.gmra.mxu2 %v2791_v56  ;;  %417 = vmatpush.msrb.mxu0 %v3792_v25  ;;  %v2956_v25 = vsub.f32 %v46_v37, %v2926_v14  ;;  %v653_v56 = vand.u32 4294901760, %v652_v54  ;;  %v664_v37 = vsub.f32 %v2913_v20, %v3775_v0 }
  0x38   :  { %486 = vmatpush.msrb.mxu1 %v2497_v11  ;;  %642 = vmatpush.msrb.mxu3 %v641_v9  ;;  %v18_v11 = vld [vmem:[%s3739_s0 + $0x8] sm:$0xff]  ;;  %v3795_v9 = vand.u32 4294901760, %v2563_v35  ;;  %v2979_v35 = vsub.f32 %v45_v18, %v2947_v4 }
  0x39   :  { %374 = vmatmul.f32.gmra.mxu3 %v3793_v13  ;;  %543 = vmatpush.msrb.mxu2 %v2829_v31  ;;  %v2965_v13 = vand.u32 4294901760, %v44_v15  ;;  %v2981_v54 = vand.u32 4294901760, %v18_v11  ;;  %v675_v0 = vand.u32 4294901760, %v2956_v25 }
  0x3a   :  { %421 = vmatpush.msrb.mxu0 %v3795_v9  ;;  %488 = vmatpush.msrb.mxu1 %v2516_v17  ;;  %v130_v17 = vsub.f32 %v2920_v5, %v3776_v40  ;;  %v659_v9 = vand.u32 4294901760, %v658_v3 }
  0x3b   :  { %124 = vmatmul.f32.gmra.mxu0 %v123_v43  ;;  %241 = vmatmul.f32.gmra.mxu1 %v2754_v24  ;;  %v3796_v43 = vand.u32 4294901760, %v2577_v42  ;;  %v2994_v40 = vsub.f32 %v44_v15, %v2965_v13  ;;  %v3798_v42 = vand.u32 4294901760, %v2592_v48  ;;  %v676_v48 = vsub.f32 %v2956_v25, %v675_v0 }
  0x3c   :  { %545 = vmatpush.msrb.mxu2 %v2838_v41  ;;  %648 = vmatpush.msrb.mxu3 %v647_v19  ;;  %v3797_v19 = vand.u32 4294901760, %v2936_v10  ;;  %v131_v3 = vand.u32 4294901760, %v130_v17  ;;  %v3011_v15 = vsub.f32 %v43_v29, %v2987_v55  ;;  %v3801_v17 = vand.u32 4294901760, %v2637_v2 }
  0x3d   :  { %425 = vmatpush.msrb.mxu0 %v3796_v43  ;;  %490 = vmatpush.msrb.mxu1 %v2527_v21  ;;  %v665_v21 = vand.u32 4294901760, %v664_v37  ;;  %v3003_v43 = vsub.f32 %v18_v11, %v2981_v54  ;;  %v3800_v37 = vand.u32 4294901760, %v2848_v60 }
  0x3e   :  { %654 = vmatpush.msrb.mxu3 %v653_v56  ;;  %547 = vmatpush.msrb.mxu2 %v2864_v38  ;;  %v670_v18 = vsub.f32 %v2936_v10, %v3797_v19  ;;  %v681_v56 = vand.u32 4294901760, %v2979_v35  ;;  %v3799_v19 = vand.u32 4294901760, %v2619_v59  ;;  %v687_v59 = vand.u32 4294901760, %v2994_v40 }
  0x3f   :  { %429 = vmatpush.msrb.mxu0 %v3798_v42  ;;  %318 = vmatmul.f32.gmra.mxu2 %v2848_v60  ;;  %v693_v2 = vand.u32 4294901760, %v3011_v15 }
  0x40   :  { %492 = vmatpush.msrb.mxu1 %v2542_v28  ;;  %549 = vmatpush.msrb.mxu2 %v2881_v49  ;;  %v20_v28 = vld [vmem:[%s3739_s0 + $0x18] sm:$0xff]  ;;  %v671_v11 = vand.u32 4294901760, %v670_v18  ;;  %v682_v29 = vsub.f32 %v2979_v35, %v681_v56  ;;  %v677_v18 = vand.u32 4294901760, %v676_v48  ;;  %v688_v42 = vsub.f32 %v2994_v40, %v687_v59 }
  0x41   :  { %433 = vmatpush.msrb.mxu0 %v3799_v19  ;;  %660 = vmatpush.msrb.mxu3 %v659_v9  ;;  %v562_v9 = vand.u32 4294901760, %v3003_v43  ;;  %v3027_v60 = vand.u32 4294901760, %v20_v28  ;;  %v3804_v19 = vand.u32 4294901760, %v2695_v57 }
  0x42   :  { %380 = vmatmul.f32.gmra.mxu3 %v3800_v37  ;;  %494 = vmatpush.msrb.mxu1 %v2560_v34  ;;  %v3802_v34 = vand.u32 4294901760, %v2657_v30  ;;  %v683_v30 = vand.u32 4294901760, %v682_v29  ;;  %v689_v48 = vand.u32 4294901760, %v688_v42  ;;  %v22_v37 = vld [vmem:[%s3739_s0 + $0x28] sm:$0xff]  ;;  %v3808_v29 = vand.u32 4294901760, %v2698_v61  ;;  %v3810_v42 = vld [vmem:[#allocation4_spill] sm:$0xff] }
  0x43   :  { %437 = vmatpush.msrb.mxu0 %v3801_v17  ;;  %666 = vmatpush.msrb.mxu3 %v665_v21  ;;  %v3803_v21 = vand.u32 4294901760, %v2677_v44  ;;  %v694_v44 = vsub.f32 %v3011_v15, %v693_v2  ;;  %v3066_v17 = vand.u32 4294901760, %v22_v37 }
  0x44   :  { %132 = vmatmul.f32.gmra.mxu0 %v131_v3  ;;  %245 = vmatmul.f32.gmra.mxu1 %v2820_v36  ;;  %v563_v3 = vsub.f32 %v3003_v43, %v562_v9 }
  0x45   :  { %551 = vmatpush.msrb.mxu2 %v2903_v63  ;;  %441 = vmatpush.msrb.mxu0 %v3802_v34  ;;  %v3078_v34 = vsub.f32 %v22_v37, %v3066_v17  ;;  %v3816_v37 = vand.u32 4294901760, %v2814_v39 }
  0x46   :  { %496 = vmatpush.msrb.mxu1 %v2586_v46  ;;  %672 = vmatpush.msrb.mxu3 %v671_v11  ;;  %v3046_v46 = vsub.f32 %v20_v28, %v3027_v60  ;;  %v3806_v28 = vand.u32 4294901760, %v2710_v26  ;;  %v564_v57 = vand.u32 4294901760, %v563_v3 }
  0x47   :  { %553 = vmatpush.msrb.mxu2 %v2926_v14  ;;  %445 = vmatpush.msrb.mxu0 %v3803_v21  ;;  %v3811_v21 = vand.u32 4294901760, %v3810_v42 }
  0x48   :  { %323 = vmatmul.f32.gmra.mxu2 %v2920_v5  ;;  %498 = vmatpush.msrb.mxu1 %v2601_v52  ;;  %v3805_v52 = vand.u32 4294901760, %v2920_v5  ;;  %v570_v11 = vand.u32 4294901760, %v3046_v46  ;;  %v695_v5 = vand.u32 4294901760, %v694_v44 }
  0x49   :  { %678 = vmatpush.msrb.mxu3 %v677_v18  ;;  %449 = vmatpush.msrb.mxu0 %v3804_v19  ;;  %v24_v18 = vld [vmem:[%s3739_s0 + $0x38] sm:$0xff] }
  0x4a   :  { %555 = vmatpush.msrb.mxu2 %v2947_v4  ;;  %386 = vmatmul.f32.gmra.mxu3 %v3805_v52  ;;  %v571_v26 = vsub.f32 %v3046_v46, %v570_v11  ;;  %v3093_v3 = vand.u32 4294901760, %v24_v18  ;;  %v3812_v19 = vld [vmem:[#allocation5_spill] sm:$0xff] }
  0x4b   :  { %500 = vmatpush.msrb.mxu1 %v2616_v58  ;;  %453 = vmatpush.msrb.mxu0 %v3806_v28  ;;  %v3807_v58 = vld [vmem:[#allocation2_spill] sm:$0xff]  ;;  %v3813_v44 = vand.u32 4294901760, %v3812_v19 }
  0x4c   :  { %557 = vmatpush.msrb.mxu2 %v2965_v13  ;;  %684 = vmatpush.msrb.mxu3 %v683_v30  ;;  %v578_v30 = vand.u32 4294901760, %v3078_v34  ;;  %v3108_v52 = vsub.f32 %v24_v18, %v3093_v3 }
  0x4d   :  { %249 = vmatmul.f32.gmra.mxu1 %v2893_v16  ;;  %455 = vmatmul.f32.vlgmr.msrb.gmra.mxu0 %v2639_v6 }
  0x4e   :  { %502 = vmatpush.msrb.mxu1 %v2634_v1  ;;  %690 = vmatpush.msrb.mxu3 %v689_v48  ;;  %v3809_v1 = vld [vmem:[#allocation3_spill] sm:$0xff] }
  0x4f   :  { %559 = vmatpush.msrb.mxu2 %v2987_v55  ;;  %720 = vmatpush.msra.mxu0 %v2698_v61  ;;  %v572_v61 = vand.u32 4294901760, %v571_v26 }
  0x50   :  { %504 = vmatpush.msrb.mxu1 %v3807_v58  ;;  %565 = vmatmul.f32.vlgmr.msrb.gmra.mxu2 %v564_v57 }
  0x51   :  { %696 = vmatpush.msrb.mxu3 %v695_v5  ;;  %858 = vmatpush.msra.mxu2 %v3808_v29 }
  0x52   :  { %506 = vmatpush.msrb.mxu1 %v3809_v1  ;;  %698 = vmatmul.f32.vlgmr.msrb.gmra.mxu3 %v2981_v54 }
  0x53   :  { %941 = vmatpush.msra.mxu3 %v2662_v32  ;;  %862 = vmatpush.msra.mxu2 %v3811_v21 }
  0x54   :  { %793 = vmatpush.msra.mxu1 %v2662_v32  ;;  %723 = vmatpush.msra.mxu0 %v3810_v42  ;;  %v3814_v32 = vand.u32 4294901760, %v2772_v51  ;;  %v994_v42 = vld [vmem:[%s3741_s3 + $0x8] sm:$0xff] }
  0x55   :  { %459 = vmatmul.f32.gmra.mxu0 %v2687_v53  ;;  %508 = vmatmul.f32.vlgmr.msrb.gmra.mxu1 %v2639_v6  ;;  %v579_v6 = vsub.f32 %v3078_v34, %v578_v30 }
  0x56   :  { %866 = vmatpush.msra.mxu2 %v3813_v44  ;;  %943 = vmatpush.msra.mxu3 %v2679_v45 }
  0x57   :  { %726 = vmatpush.msra.mxu0 %v3812_v19  ;;  %795 = vmatpush.msra.mxu1 %v2679_v45  ;;  %v3815_v45 = vand.u32 4294901760, %v2795_v12  ;;  %v580_v48 = vand.u32 4294901760, %v579_v6  ;;  %v993_v19 = vld [vmem:[%s3741_s3] sm:$0xff] }
  0x58   :  { %945 = vmatpush.msra.mxu3 %v2702_v8  ;;  %573 = vmatmul.f32.gmra.mxu2 %v572_v61  ;;  %v3309_v61 = vand.u32 4294901760, %v994_v42  ;;  %v3323_v6 = vand.u32 4294901760, %v993_v19 }
  0x59   :  { %870 = vmatpush.msra.mxu2 %v3814_v32  ;;  %797 = vmatpush.msra.mxu1 %v2702_v8  ;;  %v26_v8 = vld [vmem:[%s3739_s0 + $0x48] sm:$0x3f] }
  0x5a   :  { %702 = vmatmul.f32.gmra.mxu3 %v3027_v60  ;;  %729 = vmatpush.msra.mxu0 %v2772_v51  ;;  %v586_v51 = vand.u32 4294901760, %v3108_v52  ;;  %v3126_v28 = vand.u32 4294901760, %v26_v8  ;;  %v3321_v32 = vsub.f32 %v994_v42, %v3309_v61 }
  0x5b   :  { %874 = vmatpush.msra.mxu2 %v3815_v45  ;;  %947 = vmatpush.msra.mxu3 %v2740_v50 }
  0x5c   :  { %732 = vmatpush.msra.mxu0 %v2795_v12  ;;  %799 = vmatpush.msra.mxu1 %v2740_v50  ;;  %v3817_v12 = vand.u32 4294901760, %v2827_v62 }
  0x5d   :  { %463 = vmatmul.f32.gmra.mxu0 %v2754_v24  ;;  %512 = vmatmul.f32.gmra.mxu1 %v2687_v53  ;;  %v587_v53 = vsub.f32 %v3108_v52, %v586_v51 }
  0x5e   :  { %949 = vmatpush.msra.mxu3 %v2766_v23  ;;  %878 = vmatpush.msra.mxu2 %v3816_v37 }
  0x5f   :  { %801 = vmatpush.msra.mxu1 %v2766_v23  ;;  %735 = vmatpush.msra.mxu0 %v2814_v39  ;;  %v3140_v23 = vsub.f32 %v26_v8, %v3126_v28  ;;  %v3818_v39 = vand.u32 4294901760, %v2857_v47  ;;  %v588_v50 = vand.u32 4294901760, %v587_v53  ;;  %v3334_v8 = vand.u32 4294901760, %v3321_v32 }
  0x60   :  { %882 = vmatpush.msra.mxu2 %v3817_v12  ;;  %951 = vmatpush.msra.mxu3 %v2784_v22 }
  0x61   :  { %581 = vmatmul.f32.gmra.mxu2 %v580_v48  ;;  %738 = vmatpush.msra.mxu0 %v2827_v62  ;;  %v594_v62 = vand.u32 4294901760, %v3140_v23  ;;  %v3338_v48 = vsub.f32 %v993_v19, %v3323_v6 }
  0x62   :  { %803 = vmatpush.msra.mxu1 %v2784_v22  ;;  %953 = vmatpush.msra.mxu3 %v2797_v33  ;;  %v3819_v22 = vand.u32 4294901760, %v2875_v7 }
  0x63   :  { %706 = vmatmul.f32.gmra.mxu3 %v3066_v17  ;;  %886 = vmatpush.msra.mxu2 %v3818_v39  ;;  %v3346_v37 = vand.u32 4294901760, %v3338_v48 }
  0x64   :  { %741 = vmatpush.msra.mxu0 %v2857_v47  ;;  %805 = vmatpush.msra.mxu1 %v2797_v33  ;;  %v3820_v33 = vand.u32 4294901760, %v2897_v27  ;;  %v595_v47 = vsub.f32 %v3140_v23, %v594_v62 }
  0x65   :  { %467 = vmatmul.f32.gmra.mxu0 %v2820_v36  ;;  %516 = vmatmul.f32.gmra.mxu1 %v2754_v24  ;;  %v3821_v24 = vand.u32 4294901760, %v2913_v20  ;;  %v1107_v53 = vsub.f32 %v3338_v48, %v3346_v37 }
  0x66   :  { %890 = vmatpush.msra.mxu2 %v3819_v22  ;;  %955 = vmatpush.msra.mxu3 %v2829_v31 }
  0x67   :  { %744 = vmatpush.msra.mxu0 %v2875_v7  ;;  %807 = vmatpush.msra.mxu1 %v2829_v31  ;;  %v596_v7 = vand.u32 4294901760, %v595_v47  ;;  %v3822_v31 = vand.u32 4294901760, %v2936_v10 }
  0x68   :  { %957 = vmatpush.msra.mxu3 %v2838_v41  ;;  %894 = vmatpush.msra.mxu2 %v3820_v33 }
  0x69   :  { %747 = vmatpush.msra.mxu0 %v2897_v27  ;;  %589 = vmatmul.f32.gmra.mxu2 %v588_v50  ;;  %v3360_v50 = vand.u32 4294901760, %v1107_v53 }
  0x6a   :  { %809 = vmatpush.msra.mxu1 %v2838_v41  ;;  %898 = vmatpush.msra.mxu2 %v3821_v24 }
  0x6b   :  { %750 = vmatpush.msra.mxu0 %v2913_v20  ;;  %959 = vmatpush.msra.mxu3 %v2864_v38 }
  0x6c   :  { %710 = vmatmul.f32.gmra.mxu3 %v3093_v3  ;;  %811 = vmatpush.msra.mxu1 %v2864_v38 }
  0x6d   :  { %753 = vmatpush.msra.mxu0 %v2936_v10  ;;  %961 = vmatpush.msra.mxu3 %v2881_v49 }
  0x6e   :  { %471 = vmatmul.f32.gmra.mxu0 %v2893_v16  ;;  %520 = vmatmul.f32.gmra.mxu1 %v2820_v36 }
  0x6f   :  { %902 = vmatpush.msra.mxu2 %v3822_v31  ;;  %756 = vmatpush.msra.mxu0 %v2956_v25 }
  0x70   :  { %813 = vmatpush.msra.mxu1 %v2881_v49  ;;  %963 = vmatpush.msra.mxu3 %v2903_v63 }
  0x71   :  { %906 = vmatpush.msra.mxu2 %v675_v0  ;;  %759 = vmatpush.msra.mxu0 %v2979_v35 }
  0x72   :  { %597 = vmatmul.f32.gmra.mxu2 %v596_v7  ;;  %815 = vmatpush.msra.mxu1 %v2903_v63 }
  0x73   :  { %965 = vmatpush.msra.mxu3 %v2926_v14  ;;  %762 = vmatpush.msra.mxu0 %v2994_v40 }
  0x74   :  { %910 = vmatpush.msra.mxu2 %v681_v56  ;;  %714 = vmatmul.f32.gmra.mxu3 %v3126_v28 }
  0x75   :  { %817 = vmatpush.msra.mxu1 %v2926_v14  ;;  %765 = vmatpush.msra.mxu0 %v3011_v15 }
  0x76   :  { %914 = vmatpush.msra.mxu2 %v687_v59  ;;  %967 = vmatpush.msra.mxu3 %v2947_v4 }
  0x77   :  { %524 = vmatmul.f32.gmra.mxu1 %v2893_v16  ;;  %768 = vmatmul.f32.vlgmr.msra.gmra.mxu0 %v3003_v43 }
  0x78   :  { %819 = vmatpush.msra.mxu1 %v2947_v4  ;;  %969 = vmatpush.msra.mxu3 %v2965_v13 }
  0x79   :  { %918 = vmatpush.msra.mxu2 %v693_v2 }
  0x7a   :  { %821 = vmatpush.msra.mxu1 %v2965_v13  ;;  %920 = vmatmul.f32.vlgmr.msra.gmra.mxu2 %v2981_v54 }
  0x7b   :  { %971 = vmatpush.msra.mxu3 %v2987_v55 }
  0x7c   :  { %823 = vmatpush.msra.mxu1 %v2987_v55  ;;  %973 = vmatmul.f32.vlgmr.msra.gmra.mxu3 %v2981_v54  ;;  %v996_v54 = vld [vmem:[%s3741_s3 + $0x18] sm:$0xff] }
  0x7d   :  { %v3258_v56 = vand.u32 4294901760, %v996_v54 }
  0x7f   :  { %773 = vmatmul.f32.gmra.mxu0 %v3046_v46  ;;  %827 = vmatmul.f32.vlgmr.msra.gmra.mxu1 %v562_v9  ;;  %v3262_v43 = vsub.f32 %v996_v54, %v3258_v56 }
  0x80   :  { %1026 = vmatpush.msrb.mxu0 %v3258_v56  ;;  %1194 = vmatpush.msrb.mxu3 %v3258_v56 }
  0x81   :  { %v3270_v9 = vand.u32 4294901760, %v3262_v43  ;;  %1145 = vmatpush.msrb.mxu2 %v3262_v43 }
  0x82   :  { %924 = vmatmul.f32.gmra.mxu2 %v3027_v60 }
  0x83   :  { %v1089_v2 = vsub.f32 %v3262_v43, %v3270_v9 }
  0x84   :  { %977 = vmatmul.f32.gmra.mxu3 %v3027_v60 }
  0x85   :  { %v3279_v57 = vand.u32 4294901760, %v1089_v2 }
  0x87   :  { %778 = vmatmul.f32.gmra.mxu0 %v3078_v34  ;;  %833 = vmatmul.f32.gmra.mxu1 %v570_v11  ;;  %v995_v11 = vld [vmem:[%s3741_s3 + $0x10] sm:$0xff] }
  0x88   :  { %1091 = vmatpush.msrb.mxu1 %v3279_v57  ;;  %v3285_v5 = vand.u32 4294901760, %v995_v11 }
  0x8a   :  { %928 = vmatmul.f32.gmra.mxu2 %v3066_v17  ;;  %1028 = vmatpush.msrb.mxu0 %v3285_v5  ;;  %v3293_v29 = vsub.f32 %v995_v11, %v3285_v5 }
  0x8b   :  { %1196 = vmatpush.msrb.mxu3 %v3285_v5 }
  0x8c   :  { %981 = vmatmul.f32.gmra.mxu3 %v3066_v17  ;;  %v3299_v1 = vand.u32 4294901760, %v3293_v29  ;;  %1148 = vmatpush.msrb.mxu2 %v3293_v29 }
  0x8d   :  { %1030 = vmatpush.msrb.mxu0 %v3309_v61  ;;  %1198 = vmatpush.msrb.mxu3 %v3309_v61 }
  0x8e   :  { %v1095_v18 = vsub.f32 %v3293_v29, %v3299_v1  ;;  %1151 = vmatpush.msrb.mxu2 %v3321_v32 }
  0x8f   :  { %783 = vmatmul.f32.gmra.mxu0 %v3108_v52  ;;  %839 = vmatmul.f32.gmra.mxu1 %v578_v30  ;;  %v3329_v52 = vld [vmem:[%s3740_s2] ss:$0 sm:$0xff] }
  0x90   :  { %v3307_v21 = vand.u32 4294901760, %v1095_v18  ;;  %1032 = vmatpush.msrb.mxu0 %v3323_v6  ;;  %1200 = vmatpush.msrb.mxu3 %v3323_v6 }
  0x91   :  { %1154 = vmatpush.msrb.mxu2 %v3338_v48 }
  0x92   :  { %932 = vmatmul.f32.gmra.mxu2 %v3093_v3  ;;  %1097 = vmatpush.msrb.mxu1 %v3307_v21 }
  0x93   :  { %1247 = vmatpush.msra.mxu0 %v3270_v9 }
  0x94   :  { %985 = vmatmul.f32.gmra.mxu3 %v3093_v3 }
  0x95   :  { %1251 = vmatpush.msra.mxu0 %v3299_v1 }
  0x97   :  { %788 = vmatmul.f32.gmra.mxu0 %v3140_v23  ;;  %845 = vmatmul.f32.gmra.mxu1 %v586_v51  ;;  %v1101_v51 = vsub.f32 %v3321_v32, %v3334_v8 }
  0x98   :  { %1255 = vmatpush.msra.mxu0 %v3334_v8 }
  0x99   :  { %v3352_v12 = vand.u32 4294901760, %v1101_v51 }
  0x9a   :  { %936 = vmatmul.f32.gmra.mxu2 %v3126_v28  ;;  %1259 = vmatpush.msra.mxu0 %v3346_v37 }
  0x9b   :  { %1103 = vmatpush.msrb.mxu1 %v3352_v12 }
  0x9c   :  { %989 = vmatmul.f32.gmra.mxu3 %v3126_v28 }
  0x9d   :  { %1109 = vmatpush.msrb.mxu1 %v3360_v50 }
  0x9f   :  { %851 = vmatmul.f32.gmra.mxu1 %v594_v62 }
  0xa0   :  { %v3221_v36 = vpop.f32.mrf.mxu0  ;;  %1294 = vmatpush.msra.mxu1 %v3258_v56 }
  0xa1   :  { %v102_v28 = vadd.f32 %v3329_v52, %v3221_v36 }
  0xa2   :  { %1296 = vmatpush.msra.mxu1 %v3285_v5 }
  0xa4   :  { %1298 = vmatpush.msra.mxu1 %v3309_v61 }
  0xa6   :  { %1300 = vmatpush.msra.mxu1 %v3323_v6 }
  0xa8   :  { %v3223_v41 = vpop.f32.mrf.mxu0  ;;  %v3225_v38 = vpop.f32.mrf.mxu1 }
  0xa9   :  { %v3227_v27 = vpop.f32.mrf.mxu2  ;;  %v3229_v49 = vpop.f32.mrf.mxu3  ;;  %v235_v62 = vadd.f32 %v3225_v38, %v102_v28  ;;  %v110_v24 = vadd.f32 %v3329_v52, %v3223_v41 }
  0xab   :  { %v305_v47 = vadd.f32 %v3227_v27, %v235_v62 }
  0xad   :  { %v364_v38 = vadd.f32 %v3229_v49, %v305_v47 }
  0xb0   :  { %v3231_v16 = vpop.f32.mrf.mxu0  ;;  %v3233_v40 = vpop.f32.mrf.mxu1 }
  0xb1   :  { %v3235_v63 = vpop.f32.mrf.mxu2  ;;  %v239_v54 = vadd.f32 %v3233_v40, %v110_v24  ;;  %v118_v41 = vadd.f32 %v3329_v52, %v3231_v16 }
  0xb2   :  { %v3237_v20 = vpop.f32.mrf.mxu3 }
  0xb3   :  { %v310_v27 = vadd.f32 %v3235_v63, %v239_v54 }
  0xb5   :  { %v370_v51 = vadd.f32 %v3237_v20, %v310_v27 }
  0xb8   :  { %v3239_v14 = vpop.f32.mrf.mxu0  ;;  %v3241_v10 = vpop.f32.mrf.mxu1 }
  0xb9   :  { %v243_v28 = vadd.f32 %v3241_v10, %v118_v41  ;;  %v126_v16 = vadd.f32 %v3329_v52, %v3239_v14 }
  0xba   :  { %v3243_v0 = vpop.f32.mrf.mxu2 }
  0xbb   :  { %v315_v63 = vadd.f32 %v3243_v0, %v243_v28 }
  0xbc   :  { %v3245_v4 = vpop.f32.mrf.mxu3 }
  0xbd   :  { %v376_v10 = vadd.f32 %v3245_v4, %v315_v63 }
  0xc1   :  { %v3247_v25 = vpop.f32.mrf.mxu0  ;;  %v3249_v55 = vpop.f32.mrf.mxu1 }
  0xc2   :  { %v3251_v13 = vpop.f32.mrf.mxu2  ;;  %v134_v0 = vadd.f32 %v3329_v52, %v3247_v25 }
  0xc5   :  { %v3253_v35 = vpop.f32.mrf.mxu3 }
  0xca   :  { %v3265_v15 = vpop.f32.mrf.mxu1  ;;  %v3267_v59 = vpop.f32.mrf.mxu0 }
  0xcb   :  { %v3273_v60 = vpop.f32.mrf.mxu2  ;;  %v457_v2 = vadd.f32 %v3267_v59, %v364_v38  ;;  %v251_v25 = vadd.f32 %v3265_v15, %v134_v0 }
  0xcd   :  { %v3277_v46 = vpop.f32.mrf.mxu3  ;;  %v325_v63 = vadd.f32 %v3273_v60, %v251_v25 }
  0xd2   :  { %v3287_v17 = vpop.f32.mrf.mxu0  ;;  %v509_v58 = vpop.f32.mrf.mxu1 }
  0xd3   :  { %v3289_v26 = vpop.f32.mrf.mxu2  ;;  %v510_v18 = vadd.f32 %v509_v58, %v457_v2  ;;  %v461_v59 = vadd.f32 %v3287_v17, %v370_v51 }
  0xd5   :  { %v3296_v34 = vpop.f32.mrf.mxu3  ;;  %v567_v49 = vadd.f32 %v3289_v26, %v510_v18  ;;  %v247_v26 = vadd.f32 %v3249_v55, %v126_v16 }
  0xd7   :  { %v700_v58 = vadd.f32 %v3296_v34, %v567_v49  ;;  %v320_v34 = vadd.f32 %v3251_v13, %v247_v26 }
  0xd9   :  { %v382_v51 = vadd.f32 %v3253_v35, %v320_v34 }
  0xda   :  { %v3311_v30 = vpop.f32.mrf.mxu0  ;;  %v513_v3 = vpop.f32.mrf.mxu1 }
  0xdb   :  { %v3316_v44 = vpop.f32.mrf.mxu2  ;;  %v514_v62 = vadd.f32 %v513_v3, %v461_v59  ;;  %v465_v2 = vadd.f32 %v3311_v30, %v376_v10  ;;  %v388_v10 = vadd.f32 %v3277_v46, %v325_v63 }
  0xdd   :  { %v3331_v45 = vpop.f32.mrf.mxu3  ;;  %v575_v38 = vadd.f32 %v3316_v44, %v514_v62 }
  0xdf   :  { %v704_v3 = vadd.f32 %v3331_v45, %v575_v38 }
  0xe2   :  { %v3356_v23 = vpop.f32.mrf.mxu0  ;;  %v517_v39 = vpop.f32.mrf.mxu1 }
  0xe3   :  { %v518_v27 = vadd.f32 %v517_v39, %v465_v2  ;;  %v469_v39 = vadd.f32 %v3356_v23, %v382_v51 }
  0xe4   :  { %v582_v22 = vpop.f32.mrf.mxu2 }
  0xe5   :  { %v583_v52 = vadd.f32 %v582_v22, %v518_v27 }
  0xe6   :  { %v3365_v33 = vpop.f32.mrf.mxu3 }
  0xeb   :  { %v3373_v7 = vpop.f32.mrf.mxu0  ;;  %v521_v31 = vpop.f32.mrf.mxu1 }
  0xec   :  { %v3375_v36 = vpop.f32.mrf.mxu2  ;;  %v522_v35 = vadd.f32 %v521_v31, %v469_v39 }
  0xee   :  { %v591_v26 = vadd.f32 %v3375_v36, %v522_v35 }
  0xef   :  { %v3381_v11 = vpop.f32.mrf.mxu3 }
  0xf4   :  { %v3386_v42 = vpop.f32.mrf.mxu1  ;;  %v769_v19 = vpop.f32.mrf.mxu0 }
  0xf5   :  { %v3391_v40 = vpop.f32.mrf.mxu2  ;;  %v770_v24 = vadd.f32 %v769_v19, %v700_v58  ;;  %v708_v58 = vadd.f32 %v3365_v33, %v583_v52 }
  0xf7   :  { %v3394_v53 = vpop.f32.mrf.mxu3 }
  0xfc   :  { %v774_v20 = vpop.f32.mrf.mxu0  ;;  %v828_v47 = vpop.f32.mrf.mxu1 }
  0xfd   :  { %v829_v17 = vadd.f32 %v828_v47, %v770_v24  ;;  %v921_v54 = vpop.f32.mrf.mxu2  ;;  %v775_v55 = vadd.f32 %v774_v20, %v704_v3 }
  0xff   :  { %v922_v41 = vadd.f32 %v921_v54, %v829_v17  ;;  %v974_v14 = vpop.f32.mrf.mxu3  ;;  %v473_v17 = vadd.f32 %v3373_v7, %v388_v10 }
 0x101   :  { %v3408_v4 = vadd.f32 %v974_v14, %v922_v41  ;;  %v712_v14 = vadd.f32 %v3381_v11, %v591_v26  ;;  %v526_v46 = vadd.f32 %v3386_v42, %v473_v17  ;;  %v2422_v17 = vld [vmem:[%s3741_s3 + $0x38] sm:$0xff] }
 0x103   :  { %v999_v44 = vsel %vm997_vm0, %v3408_v4, 0  ;;  %v599_v7 = vadd.f32 %v3391_v40, %v526_v46 }
 0x104   :  { %v3412_v18 = vand.u32 4294901760, %v999_v44  ;;  %v779_v30 = vpop.f32.mrf.mxu0  ;;  %v834_v19 = vpop.f32.mrf.mxu1 }
 0x105   :  { %v835_v28 = vadd.f32 %v834_v19, %v775_v55  ;;  %v925_v13 = vpop.f32.mrf.mxu2  ;;  %v780_v22 = vadd.f32 %v779_v30, %v708_v58 }
 0x106   :  { %v1034_v45 = vsub.f32 %v999_v44, %v3412_v18  ;;  %1111 = vmatmul.f32.vlgmr.msrb.gmra.mxu1 %v3412_v18 }
 0x107   :  { %v926_v49 = vadd.f32 %v925_v13, %v835_v28  ;;  %v978_v59 = vpop.f32.mrf.mxu3  ;;  %v716_v28 = vadd.f32 %v3394_v53, %v599_v7  ;;  %v2420_v7 = vld [vmem:[%s3741_s3 + $0x28] sm:$0xff] }
 0x108   :  { %1157 = vmatmul.f32.vlgmr.msrb.gmra.mxu2 %v1034_v45  ;;  %v1035_v16 = vand.u32 4294901760, %v1034_v45 }
 0x109   :  { %v3421_v62 = vadd.f32 %v978_v59, %v926_v49 }
 0x10a   :  { %1204 = vmatmul.f32.vlgmr.msrb.gmra.mxu3 %v1035_v16  ;;  %v1036_v15 = vsub.f32 %v1034_v45, %v1035_v16 }
 0x10b   :  { %v1002_v24 = vsel %vm997_vm0, %v3421_v62, 0 }
 0x10c   :  { %v3425_v20 = vand.u32 4294901760, %v1002_v24  ;;  %v840_v23 = vpop.f32.mrf.mxu1  ;;  %v1037_v47 = vand.u32 4294901760, %v1036_v15  ;;  %v784_v33 = vpop.f32.mrf.mxu0 }
 0x10d   :  { %v841_v60 = vadd.f32 %v840_v23, %v780_v22  ;;  %v929_v38 = vpop.f32.mrf.mxu2  ;;  %v785_v34 = vadd.f32 %v784_v33, %v712_v14  ;;  %v2421_v14 = vld [vmem:[%s3741_s3 + $0x30] sm:$0xff] }
 0x10e   :  { %1038 = vmatmul.f32.vlgmr.msrb.gmra.mxu0 %v1037_v47  ;;  %1115 = vmatmul.f32.gmra.mxu1 %v3425_v20  ;;  %v1042_v31 = vsub.f32 %v1002_v24, %v3425_v20 }
 0x10f   :  { %v930_v54 = vadd.f32 %v929_v38, %v841_v60  ;;  %v982_v2 = vpop.f32.mrf.mxu3 }
 0x110   :  { %1162 = vmatmul.f32.gmra.mxu2 %v1042_v31  ;;  %v1043_v41 = vand.u32 4294901760, %v1042_v31 }
 0x111   :  { %v3434_v0 = vadd.f32 %v982_v2, %v930_v54  ;;  %v3455_v54 = vand.u32 4294901760, %v2422_v17 }
 0x112   :  { %1210 = vmatmul.f32.gmra.mxu3 %v1043_v41  ;;  %v1044_v36 = vsub.f32 %v1042_v31, %v1043_v41 }
 0x113   :  { %v1005_v3 = vsel %vm997_vm0, %v3434_v0, 0  ;;  %1360 = vmatpush.msra.mxu2 %v3455_v54  ;;  %1528 = vmatpush.msrb.mxu1 %v3455_v54 }
 0x114   :  { %v1049_v27 = vand.u32 4294901760, %v1005_v3  ;;  %v846_v55 = vpop.f32.mrf.mxu1  ;;  %v1045_v44 = vand.u32 4294901760, %v1044_v36  ;;  %v789_v25 = vpop.f32.mrf.mxu0  ;;  %v3475_v36 = vand.u32 4294901760, %v2421_v14 }
 0x115   :  { %v847_v30 = vadd.f32 %v846_v55, %v785_v34  ;;  %v933_v19 = vpop.f32.mrf.mxu2  ;;  %v790_v39 = vadd.f32 %v789_v25, %v716_v28 }
 0x116   :  { %1046 = vmatmul.f32.gmra.mxu0 %v1045_v44  ;;  %1119 = vmatmul.f32.gmra.mxu1 %v1049_v27  ;;  %v1050_v11 = vsub.f32 %v1005_v3, %v1049_v27 }
 0x117   :  { %v934_v51 = vadd.f32 %v933_v19, %v847_v30  ;;  %v986_v42 = vpop.f32.mrf.mxu3  ;;  %1362 = vmatpush.msra.mxu2 %v3475_v36  ;;  %1530 = vmatpush.msrb.mxu1 %v3475_v36  ;;  %v3494_v19 = vand.u32 4294901760, %v2420_v7 }
 0x118   :  { %1167 = vmatmul.f32.gmra.mxu2 %v1050_v11  ;;  %v1051_v52 = vand.u32 4294901760, %v1050_v11 }
 0x119   :  { %v3440_v13 = vadd.f32 %v986_v42, %v934_v51  ;;  %1364 = vmatpush.msra.mxu2 %v3494_v19  ;;  %v3502_v25 = vsub.f32 %v2420_v7, %v3494_v19  ;;  %1532 = vmatpush.msrb.mxu1 %v3494_v19 }
 0x11a   :  { %1216 = vmatmul.f32.gmra.mxu3 %v1051_v52  ;;  %v1052_v45 = vsub.f32 %v1050_v11, %v1051_v52  ;;  %v2419_v11 = vld [vmem:[%s3741_s3 + $0x20] sm:$0xff] }
 0x11b   :  { %v1008_v40 = vsel %vm997_vm0, %v3440_v13, 0  ;;  %v3504_v52 = vand.u32 4294901760, %v2419_v11  ;;  %v3508_v28 = vand.u32 4294901760, %v3502_v25 }
 0x11c   :  { %v1057_v49 = vand.u32 4294901760, %v1008_v40  ;;  %v852_v59 = vpop.f32.mrf.mxu1  ;;  %v1053_v16 = vand.u32 4294901760, %v1052_v45 }
 0x11d   :  { %v853_v63 = vadd.f32 %v852_v59, %v790_v39  ;;  %v937_v58 = vpop.f32.mrf.mxu2  ;;  %1366 = vmatpush.msra.mxu2 %v3504_v52  ;;  %v3512_v45 = vsub.f32 %v2419_v11, %v3504_v52  ;;  %1534 = vmatpush.msrb.mxu1 %v3504_v52  ;;  %v1435_v39 = vsub.f32 %v3502_v25, %v3508_v28 }
 0x11e   :  { %1054 = vmatmul.f32.gmra.mxu0 %v1053_v16  ;;  %1123 = vmatmul.f32.gmra.mxu1 %v1057_v49  ;;  %v1058_v35 = vsub.f32 %v1008_v40, %v1057_v49 }
 0x11f   :  { %v938_v15 = vadd.f32 %v937_v58, %v853_v63  ;;  %v990_v22 = vpop.f32.mrf.mxu3  ;;  %v3520_v40 = vand.u32 4294901760, %v3512_v45 }
 0x120   :  { %1172 = vmatmul.f32.gmra.mxu2 %v1058_v35  ;;  %v1059_v53 = vand.u32 4294901760, %v1058_v35 }
 0x121   :  { %v3444_v24 = vadd.f32 %v990_v22, %v938_v15  ;;  %v1441_v59 = vsub.f32 %v3512_v45, %v3520_v40 }
 0x122   :  { %1222 = vmatmul.f32.gmra.mxu3 %v1059_v53  ;;  %v1060_v23 = vsub.f32 %v1058_v35, %v1059_v53 }
 0x123   :  { %v1011_v47 = vsel %vm997_vm0, %v3444_v24, 0 }
 0x124   :  { %v1065_v10 = vand.u32 4294901760, %v1011_v47  ;;  %v1061_v26 = vand.u32 4294901760, %v1060_v23 }
 0x126   :  { %1062 = vmatmul.f32.gmra.mxu0 %v1061_v26  ;;  %1127 = vmatmul.f32.gmra.mxu1 %v1065_v10  ;;  %v1066_v60 = vsub.f32 %v1011_v47, %v1065_v10 }
 0x128   :  { %1177 = vmatmul.f32.gmra.mxu2 %v1066_v60  ;;  %v1067_v38 = vand.u32 4294901760, %v1066_v60 }
 0x12a   :  { %1228 = vmatmul.f32.gmra.mxu3 %v1067_v38  ;;  %v1068_v33 = vsub.f32 %v1066_v60, %v1067_v38 }
 0x12c   :  { %v1069_v31 = vand.u32 4294901760, %v1068_v33 }
 0x12e   :  { %1070 = vmatmul.f32.gmra.mxu0 %v1069_v31  ;;  %1302 = vmatmul.f32.vlgmr.msra.gmra.mxu1 %v3412_v18 }
 0x12f   :  { %1769 = vmatpush.msra.mxu1 %v3279_v57  ;;  %v3534_v57 = vand.u32 4294901760, %v1441_v59 }
 0x131   :  { %1775 = vmatpush.msra.mxu1 %v3307_v21 }
 0x133   :  { %1781 = vmatpush.msra.mxu1 %v3352_v12 }
 0x135   :  { %1787 = vmatpush.msra.mxu1 %v3360_v50 }
 0x136   :  { %1261 = vmatmul.f32.vlgmr.msra.gmra.mxu0 %v3412_v18  ;;  %1306 = vmatmul.f32.gmra.mxu1 %v3425_v20  ;;  %v3461_v18 = vsub.f32 %v2422_v17, %v3455_v54 }
 0x138   :  { %1479 = vmatpush.msrb.mxu0 %v3461_v18 }
 0x13e   :  { %1265 = vmatmul.f32.gmra.mxu0 %v3425_v20  ;;  %1310 = vmatmul.f32.gmra.mxu1 %v1049_v27  ;;  %v3465_v20 = vand.u32 4294901760, %v3461_v18 }
 0x140   :  { %v1423_v41 = vsub.f32 %v3461_v18, %v3465_v20  ;;  %1581 = vmatpush.msrb.mxu2 %v3465_v20 }
 0x142   :  { %v3473_v46 = vand.u32 4294901760, %v1423_v41 }
 0x144   :  { %1425 = vmatpush.msra.mxu3 %v3473_v46 }
 0x146   :  { %1269 = vmatmul.f32.gmra.mxu0 %v1049_v27  ;;  %1314 = vmatmul.f32.gmra.mxu1 %v1057_v49  ;;  %v3480_v27 = vsub.f32 %v2421_v14, %v3475_v36 }
 0x148   :  { %v3484_v55 = vand.u32 4294901760, %v3480_v27  ;;  %1482 = vmatpush.msrb.mxu0 %v3480_v27 }
 0x14a   :  { %v1429_v44 = vsub.f32 %v3480_v27, %v3484_v55  ;;  %1485 = vmatpush.msrb.mxu0 %v3502_v25  ;;  %1585 = vmatpush.msrb.mxu2 %v3484_v55 }
 0x14c   :  { %v3492_v30 = vand.u32 4294901760, %v1429_v44  ;;  %1488 = vmatpush.msrb.mxu0 %v3512_v45  ;;  %1589 = vmatpush.msrb.mxu2 %v3508_v28 }
 0x14e   :  { %1273 = vmatmul.f32.gmra.mxu0 %v1057_v49  ;;  %1318 = vmatmul.f32.gmra.mxu1 %v1065_v10  ;;  %v3526_v49 = vand.u32 4294901760, %v1435_v39 }
 0x14f   :  { %1431 = vmatpush.msra.mxu3 %v3492_v30  ;;  %1704 = vmatpush.msra.mxu0 %v3258_v56 }
 0x150   :  { %1593 = vmatpush.msrb.mxu2 %v3520_v40 }
 0x151   :  { %1706 = vmatpush.msra.mxu0 %v3285_v5  ;;  %1437 = vmatpush.msra.mxu3 %v3526_v49 }
 0x153   :  { %1708 = vmatpush.msra.mxu0 %v3309_v61  ;;  %1443 = vmatpush.msra.mxu3 %v3534_v57 }
 0x155   :  { %1628 = vmatpush.msrb.mxu3 %v3455_v54  ;;  %1710 = vmatpush.msra.mxu0 %v3323_v6 }
 0x156   :  { %1277 = vmatmul.f32.gmra.mxu0 %v1065_v10 }
 0x157   :  { %1630 = vmatpush.msrb.mxu3 %v3475_v36 }
 0x159   :  { %1632 = vmatpush.msrb.mxu3 %v3494_v19 }
 0x15b   :  { %1634 = vmatpush.msrb.mxu3 %v3504_v52 }
 0x183   :  { %v3457_v2 = vpop.f32.mrf.mxu1 }
 0x18b   :  { %v1039_v34 = vpop.f32.mrf.mxu0  ;;  %v1116_v3 = vpop.f32.mrf.mxu1 }
 0x18c   :  { %v1158_v12 = vpop.f32.mrf.mxu2  ;;  %v1113_v15 = vadd.f32 %v3457_v2, %v1039_v34 }
 0x18d   :  { %v1205_v35 = vpop.f32.mrf.mxu3 }
 0x18e   :  { %v1159_v53 = vadd.f32 %v1158_v12, %v1113_v15 }
 0x190   :  { %v1206_v47 = vadd.f32 %v1205_v35, %v1159_v53 }
 0x193   :  { %v1047_v51 = vpop.f32.mrf.mxu0  ;;  %v1120_v42 = vpop.f32.mrf.mxu1 }
 0x194   :  { %v1163_v23 = vpop.f32.mrf.mxu2  ;;  %v1117_v10 = vadd.f32 %v1116_v3, %v1047_v51 }
 0x195   :  { %v1211_v26 = vpop.f32.mrf.mxu3 }
 0x196   :  { %v1164_v33 = vadd.f32 %v1163_v23, %v1117_v10 }
 0x198   :  { %v1212_v44 = vadd.f32 %v1211_v26, %v1164_v33 }
 0x19b   :  { %v1055_v16 = vpop.f32.mrf.mxu0  ;;  %v1124_v63 = vpop.f32.mrf.mxu1 }
 0x19c   :  { %v1168_v14 = vpop.f32.mrf.mxu2  ;;  %v1121_v7 = vadd.f32 %v1120_v42, %v1055_v16 }
 0x19d   :  { %v1217_v3 = vpop.f32.mrf.mxu3 }
 0x19e   :  { %v1169_v59 = vadd.f32 %v1168_v14, %v1121_v7 }
 0x1a3   :  { %v1063_v21 = vpop.f32.mrf.mxu0  ;;  %v3545_v58 = vpop.f32.mrf.mxu1 }
 0x1a4   :  { %v1125_v53 = vadd.f32 %v1124_v63, %v1063_v21 }
 0x1ab   :  { %v3549_v22 = vpop.f32.mrf.mxu0  ;;  %v1303_v50 = vpop.f32.mrf.mxu1 }
 0x1b3   :  { %v1262_v60 = vpop.f32.mrf.mxu0  ;;  %v1307_v17 = vpop.f32.mrf.mxu1 }
 0x1b4   :  { %v1263_v38 = vadd.f32 %v1262_v60, %v1206_v47  ;;  %v1173_v47 = vpop.f32.mrf.mxu2 }
 0x1b5   :  { %v1174_v21 = vadd.f32 %v1173_v47, %v1125_v53 }
 0x1b6   :  { %v1304_v31 = vadd.f32 %v1303_v50, %v1263_v38  ;;  %v1218_v50 = vadd.f32 %v1217_v3, %v1169_v59 }
 0x1b8   :  { %v3552_v41 = vmax.f32 %v3408_v4, %v1304_v31 }
 0x1ba   :  { %v1333_v2 = vsel %vm997_vm0, %v3552_v41, 0 }
 0x1bb   :  { %v1266_v34 = vpop.f32.mrf.mxu0  ;;  %v3556_v11 = vand.u32 4294901760, %v1333_v2  ;;  %v1311_v16 = vpop.f32.mrf.mxu1 }
 0x1bc   :  { %v1267_v39 = vadd.f32 %v1266_v34, %v1212_v44 }
 0x1bd   :  { %1445 = vmatmul.f32.vlgmr.msra.gmra.mxu3 %v3556_v11  ;;  %v1368_v51 = vsub.f32 %v1333_v2, %v3556_v11 }
 0x1be   :  { %v1308_v12 = vadd.f32 %v1307_v17, %v1267_v39  ;;  %1872 = vmatpush.msra.mxu3 %v3258_v56 }
 0x1bf   :  { %1491 = vmatmul.f32.vlgmr.msrb.gmra.mxu0 %v1368_v51  ;;  %v1369_v35 = vand.u32 4294901760, %v1368_v51 }
 0x1c0   :  { %v3562_v42 = vmax.f32 %v3421_v62, %v1308_v12  ;;  %1874 = vmatpush.msra.mxu3 %v3285_v5  ;;  %1925 = vmatpush.msrb.mxu0 %v3270_v9 }
 0x1c1   :  { %1538 = vmatmul.f32.vlgmr.msrb.gmra.mxu1 %v1369_v35  ;;  %v1370_v15 = vsub.f32 %v1368_v51, %v1369_v35 }
 0x1c2   :  { %v1336_v23 = vsel %vm997_vm0, %v3562_v42, 0  ;;  %1876 = vmatpush.msra.mxu3 %v3309_v61  ;;  %1972 = vmatpush.msrb.mxu1 %v3258_v56  ;;  %v1223_v56 = vpop.f32.mrf.mxu3 }
 0x1c3   :  { %v1270_v10 = vpop.f32.mrf.mxu0  ;;  %v1371_v26 = vand.u32 4294901760, %v1370_v15  ;;  %v3570_v60 = vand.u32 4294901760, %v1336_v23  ;;  %1929 = vmatpush.msrb.mxu0 %v3299_v1  ;;  %v1224_v31 = vadd.f32 %v1223_v56, %v1174_v21 }
 0x1c4   :  { %v1271_v9 = vadd.f32 %v1270_v10, %v1218_v50  ;;  %1878 = vmatpush.msra.mxu3 %v3323_v6  ;;  %1974 = vmatpush.msrb.mxu1 %v3285_v5 }
 0x1c5   :  { %1372 = vmatmul.f32.vlgmr.msra.gmra.mxu2 %v1371_v26  ;;  %1449 = vmatmul.f32.gmra.mxu3 %v3570_v60  ;;  %v1376_v63 = vsub.f32 %v1336_v23, %v3570_v60 }
 0x1c6   :  { %v1312_v38 = vadd.f32 %v1311_v16, %v1271_v9  ;;  %1823 = vmatpush.msra.mxu2 %v3262_v43  ;;  %1933 = vmatpush.msrb.mxu0 %v3334_v8  ;;  %v1129_v43 = vadd.f32 %v3545_v58, %v3549_v22 }
 0x1c7   :  { %1496 = vmatmul.f32.gmra.mxu0 %v1376_v63  ;;  %v1377_v33 = vand.u32 4294901760, %v1376_v63  ;;  %1976 = vmatpush.msrb.mxu1 %v3309_v61  ;;  %v1315_v61 = vpop.f32.mrf.mxu1 }
 0x1c8   :  { %v3581_v1 = vmax.f32 %v3434_v0, %v1312_v38  ;;  %1826 = vmatpush.msra.mxu2 %v3293_v29  ;;  %1937 = vmatpush.msrb.mxu0 %v3346_v37  ;;  %v1178_v37 = vpop.f32.mrf.mxu2 }
 0x1c9   :  { %1544 = vmatmul.f32.gmra.mxu1 %v1377_v33  ;;  %v1378_v5 = vsub.f32 %v1376_v63, %v1377_v33  ;;  %v1179_v2 = vadd.f32 %v1178_v37, %v1129_v43 }
 0x1ca   :  { %v1339_v8 = vsel %vm997_vm0, %v3581_v1, 0  ;;  %1829 = vmatpush.msra.mxu2 %v3321_v32  ;;  %1978 = vmatpush.msrb.mxu1 %v3323_v6  ;;  %v1229_v32 = vpop.f32.mrf.mxu3 }
 0x1cb   :  { %v1274_v17 = vpop.f32.mrf.mxu0  ;;  %v1379_v14 = vand.u32 4294901760, %v1378_v5  ;;  %v1383_v44 = vand.u32 4294901760, %v1339_v8  ;;  %v1230_v39 = vadd.f32 %v1229_v32, %v1179_v2 }
 0x1cc   :  { %v1275_v29 = vadd.f32 %v1274_v17, %v1224_v31  ;;  %1832 = vmatpush.msra.mxu2 %v3338_v48 }
 0x1cd   :  { %1380 = vmatmul.f32.gmra.mxu2 %v1379_v14  ;;  %1453 = vmatmul.f32.gmra.mxu3 %v1383_v44  ;;  %v1384_v7 = vsub.f32 %v1339_v8, %v1383_v44 }
 0x1ce   :  { %v1316_v58 = vadd.f32 %v1315_v61, %v1275_v29 }
 0x1cf   :  { %1501 = vmatmul.f32.gmra.mxu0 %v1384_v7  ;;  %v1385_v22 = vand.u32 4294901760, %v1384_v7  ;;  %v1319_v35 = vpop.f32.mrf.mxu1 }
 0x1d0   :  { %v3593_v34 = vmax.f32 %v3440_v13, %v1316_v58 }
 0x1d1   :  { %1550 = vmatmul.f32.gmra.mxu1 %v1385_v22  ;;  %v1386_v6 = vsub.f32 %v1384_v7, %v1385_v22 }
 0x1d2   :  { %v1342_v3 = vsel %vm997_vm0, %v3593_v34, 0 }
 0x1d3   :  { %v1278_v51 = vpop.f32.mrf.mxu0  ;;  %v1387_v48 = vand.u32 4294901760, %v1386_v6  ;;  %v1391_v59 = vand.u32 4294901760, %v1342_v3 }
 0x1d4   :  { %v1279_v12 = vadd.f32 %v1278_v51, %v1230_v39 }
 0x1d5   :  { %1388 = vmatmul.f32.gmra.mxu2 %v1387_v48  ;;  %1457 = vmatmul.f32.gmra.mxu3 %v1391_v59  ;;  %v1392_v16 = vsub.f32 %v1342_v3, %v1391_v59 }
 0x1d6   :  { %v1320_v15 = vadd.f32 %v1319_v35, %v1279_v12 }
 0x1d7   :  { %1506 = vmatmul.f32.gmra.mxu0 %v1392_v16  ;;  %v1393_v50 = vand.u32 4294901760, %v1392_v16 }
 0x1d8   :  { %v3598_v53 = vmax.f32 %v3444_v24, %v1320_v15 }
 0x1d9   :  { %1556 = vmatmul.f32.gmra.mxu1 %v1393_v50  ;;  %v1394_v23 = vsub.f32 %v1392_v16, %v1393_v50 }
 0x1da   :  { %v1345_v47 = vsel %vm997_vm0, %v3598_v53, 0 }
 0x1db   :  { %v1395_v10 = vand.u32 4294901760, %v1394_v23  ;;  %v1399_v26 = vand.u32 4294901760, %v1345_v47 }
 0x1dd   :  { %1396 = vmatmul.f32.gmra.mxu2 %v1395_v10  ;;  %1461 = vmatmul.f32.gmra.mxu3 %v1399_v26  ;;  %v1400_v9 = vsub.f32 %v1345_v47, %v1399_v26 }
 0x1df   :  { %1511 = vmatmul.f32.gmra.mxu0 %v1400_v9  ;;  %v1401_v63 = vand.u32 4294901760, %v1400_v9 }
 0x1e1   :  { %1562 = vmatmul.f32.gmra.mxu1 %v1401_v63  ;;  %v1402_v21 = vsub.f32 %v1400_v9, %v1401_v63 }
 0x1e3   :  { %v1403_v38 = vand.u32 4294901760, %v1402_v21 }
 0x1e5   :  { %1404 = vmatmul.f32.gmra.mxu2 %v1403_v38  ;;  %1636 = vmatmul.f32.vlgmr.msrb.gmra.mxu3 %v3556_v11 }
 0x1e6   :  { %2098 = vmatpush.msrb.mxu3 %v3473_v46 }
 0x1e8   :  { %2104 = vmatpush.msrb.mxu3 %v3492_v30 }
 0x1ea   :  { %2110 = vmatpush.msrb.mxu3 %v3526_v49 }
 0x1ec   :  { %2116 = vmatpush.msrb.mxu3 %v3534_v57 }
 0x1ed   :  { %1595 = vmatmul.f32.vlgmr.msrb.gmra.mxu2 %v3556_v11  ;;  %1640 = vmatmul.f32.gmra.mxu3 %v3570_v60 }
 0x1ee   :  { %2033 = vmatpush.msrb.mxu2 %v3455_v54 }
 0x1f0   :  { %2035 = vmatpush.msrb.mxu2 %v3475_v36 }
 0x1f2   :  { %2037 = vmatpush.msrb.mxu2 %v3494_v19 }
 0x1f4   :  { %2039 = vmatpush.msrb.mxu2 %v3504_v52 }
 0x1f5   :  { %1599 = vmatmul.f32.gmra.mxu2 %v3570_v60  ;;  %1644 = vmatmul.f32.gmra.mxu3 %v1383_v44 }
 0x1fd   :  { %1603 = vmatmul.f32.gmra.mxu2 %v1383_v44  ;;  %1648 = vmatmul.f32.gmra.mxu3 %v1391_v59 }
 0x205   :  { %1607 = vmatmul.f32.gmra.mxu2 %v1391_v59  ;;  %1652 = vmatmul.f32.gmra.mxu3 %v1399_v26 }
 0x20d   :  { %1611 = vmatmul.f32.gmra.mxu2 %v1399_v26 }
 0x23c   :  { %v1492_v43 = vpop.f32.mrf.mxu0 }
 0x23e   :  { %v1539_v8 = vpop.f32.mrf.mxu1 }
 0x240   :  { %v1446_v46 = vpop.f32.mrf.mxu3 }
 0x244   :  { %v1497_v14 = vpop.f32.mrf.mxu0 }
 0x246   :  { %v1545_v7 = vpop.f32.mrf.mxu1 }
 0x248   :  { %v1373_v30 = vpop.f32.mrf.mxu2  ;;  %v1450_v49 = vpop.f32.mrf.mxu3 }
 0x249   :  { %v1447_v61 = vadd.f32 %v1446_v46, %v1373_v30 }
 0x24b   :  { %v1493_v44 = vadd.f32 %v1492_v43, %v1447_v61 }
 0x24c   :  { %v1502_v39 = vpop.f32.mrf.mxu0 }
 0x24d   :  { %v1540_v37 = vadd.f32 %v1539_v8, %v1493_v44 }
 0x24e   :  { %v1551_v15 = vpop.f32.mrf.mxu1 }
 0x250   :  { %v1381_v57 = vpop.f32.mrf.mxu2  ;;  %v1454_v11 = vpop.f32.mrf.mxu3 }
 0x251   :  { %v1451_v29 = vadd.f32 %v1450_v49, %v1381_v57 }
 0x253   :  { %v1498_v22 = vadd.f32 %v1497_v14, %v1451_v29 }
 0x254   :  { %v1507_v26 = vpop.f32.mrf.mxu0 }
 0x255   :  { %v1546_v59 = vadd.f32 %v1545_v7, %v1498_v22 }
 0x258   :  { %v1389_v56 = vpop.f32.mrf.mxu2  ;;  %v1458_v33 = vpop.f32.mrf.mxu3 }
 0x259   :  { %v1455_v51 = vadd.f32 %v1454_v11, %v1389_v56 }
 0x25b   :  { %v1503_v50 = vadd.f32 %v1502_v39, %v1455_v51 }
 0x25d   :  { %v1552_v21 = vadd.f32 %v1551_v15, %v1503_v50 }
 0x260   :  { %v1397_v5 = vpop.f32.mrf.mxu2  ;;  %v1462_v31 = vpop.f32.mrf.mxu3 }
 0x261   :  { %v1459_v9 = vadd.f32 %v1458_v33, %v1397_v5 }
 0x263   :  { %v1508_v49 = vadd.f32 %v1507_v26, %v1459_v9 }
 0x268   :  { %v1405_v17 = vpop.f32.mrf.mxu2  ;;  %v1637_v60 = vpop.f32.mrf.mxu3 }
 0x269   :  { %v1463_v33 = vadd.f32 %v1462_v31, %v1405_v17 }
 0x270   :  { %v1596_v2 = vpop.f32.mrf.mxu2  ;;  %v1641_v6 = vpop.f32.mrf.mxu3 }
 0x271   :  { %v1597_v58 = vadd.f32 %v1596_v2, %v1540_v37 }
 0x273   :  { %v1638_v32 = vadd.f32 %v1637_v60, %v1597_v58 }
 0x275   :  { %v1656_v3 = vmax.f32 %v3552_v41, %v1638_v32 }
 0x277   :  { %v1661_v48 = vsub.f32 %v3408_v4, %v1656_v3 }
 0x278   :  { %v1600_v12 = vpop.f32.mrf.mxu2  ;;  %v1645_v10 = vpop.f32.mrf.mxu3 }
 0x279   :  { %v1666_v35 = vmul.f32 1.442695, %v1661_v48  ;;  %v1601_v16 = vadd.f32 %v1600_v12, %v1546_v59 }
 0x27b   :  { %2424 = vpow2.f32 %v1666_v35  ;;  %v1642_v23 = vadd.f32 %v1641_v6, %v1601_v16 }
 0x27d   :  { %v1657_v47 = vmax.f32 %v3562_v42, %v1642_v23  ;;  %v1557_v42 = vpop.f32.mrf.mxu1 }
 0x27e   :  { %v1558_v43 = vadd.f32 %v1557_v42, %v1508_v49 }
 0x27f   :  { %v1662_v63 = vsub.f32 %v3421_v62, %v1657_v47 }
 0x280   :  { %v1604_v41 = vpop.f32.mrf.mxu2  ;;  %v1649_v61 = vpop.f32.mrf.mxu3 }
 0x281   :  { %v3618_v38 = vpop.eup %2424  ;;  %v1668_v4 = vmul.f32 1.442695, %v1662_v63  ;;  %v1605_v46 = vadd.f32 %v1604_v41, %v1552_v21 }
 0x282   :  { %v1677_v30 = vsel %vm997_vm0, %v3618_v38, 0 }
 0x283   :  { %2426 = vpow2.f32 %v1668_v4  ;;  %v1646_v57 = vadd.f32 %v1645_v10, %v1605_v46  ;;  %v3622_v11 = vand.u32 4294901760, %v1677_v30 }
 0x285   :  { %v1658_v56 = vmax.f32 %v3581_v1, %v1646_v57  ;;  %1789 = vmatmul.f32.vlgmr.msra.gmra.mxu1 %v3622_v11  ;;  %v1712_v62 = vsub.f32 %v1677_v30, %v3622_v11  ;;  %v1512_v1 = vpop.f32.mrf.mxu0  ;;  %v1563_v22 = vpop.f32.mrf.mxu1 }
 0x286   :  { %2201 = vmatpush.msra.mxu1 %v3455_v54  ;;  %v1513_v17 = vadd.f32 %v1512_v1, %v1463_v33 }
 0x287   :  { %v1663_v5 = vsub.f32 %v3434_v0, %v1658_v56  ;;  %1835 = vmatmul.f32.vlgmr.msra.gmra.mxu2 %v1712_v62  ;;  %v1713_v8 = vand.u32 4294901760, %v1712_v62 }
 0x288   :  { %v1608_v60 = vpop.f32.mrf.mxu2  ;;  %2203 = vmatpush.msra.mxu1 %v3475_v36  ;;  %2254 = vmatpush.msra.mxu2 %v3465_v20  ;;  %v1653_v3 = vpop.f32.mrf.mxu3 }
 0x289   :  { %v3631_v14 = vpop.eup %2426  ;;  %v1670_v44 = vmul.f32 1.442695, %v1663_v5  ;;  %v1609_v29 = vadd.f32 %v1608_v60, %v1558_v43  ;;  %1882 = vmatmul.f32.vlgmr.msra.gmra.mxu3 %v1713_v8  ;;  %v1714_v31 = vsub.f32 %v1712_v62, %v1713_v8 }
 0x28a   :  { %v1680_v0 = vsel %vm997_vm0, %v3631_v14, 0  ;;  %2205 = vmatpush.msra.mxu1 %v3494_v19  ;;  %2301 = vmatpush.msra.mxu3 %v3455_v54 }
 0x28b   :  { %2428 = vpow2.f32 %v1670_v44  ;;  %v1650_v37 = vadd.f32 %v1649_v61, %v1609_v29  ;;  %v1715_v7 = vand.u32 4294901760, %v1714_v31  ;;  %v3637_v2 = vand.u32 4294901760, %v1680_v0  ;;  %2258 = vmatpush.msra.mxu2 %v3484_v55 }
 0x28c   :  { %2207 = vmatpush.msra.mxu1 %v3504_v52  ;;  %2303 = vmatpush.msra.mxu3 %v3475_v36  ;;  %v1564_v55 = vadd.f32 %v1563_v22, %v1513_v17 }
 0x28d   :  { %v1659_v20 = vmax.f32 %v3593_v34, %v1650_v37  ;;  %1716 = vmatmul.f32.vlgmr.msra.gmra.mxu0 %v1715_v7  ;;  %1793 = vmatmul.f32.gmra.mxu1 %v3637_v2  ;;  %v1720_v58 = vsub.f32 %v1680_v0, %v3637_v2 }
 0x28e   :  { %2152 = vmatpush.msra.mxu0 %v3461_v18  ;;  %2262 = vmatpush.msra.mxu2 %v3508_v28 }
 0x28f   :  { %v1664_v54 = vsub.f32 %v3440_v13, %v1659_v20  ;;  %1840 = vmatmul.f32.gmra.mxu2 %v1720_v58  ;;  %v1721_v32 = vand.u32 4294901760, %v1720_v58  ;;  %2305 = vmatpush.msra.mxu3 %v3494_v19 }
 0x290   :  { %v1612_v36 = vpop.f32.mrf.mxu2  ;;  %2155 = vmatpush.msra.mxu0 %v3480_v27  ;;  %2266 = vmatpush.msra.mxu2 %v3520_v40 }
 0x291   :  { %v3651_v34 = vpop.eup %2428  ;;  %v1672_v6 = vmul.f32 1.442695, %v1664_v54  ;;  %v1613_v39 = vadd.f32 %v1612_v36, %v1564_v55  ;;  %1888 = vmatmul.f32.gmra.mxu3 %v1721_v32  ;;  %v1722_v18 = vsub.f32 %v1720_v58, %v1721_v32 }
 0x292   :  { %v1683_v13 = vsel %vm997_vm0, %v3651_v34, 0  ;;  %2158 = vmatpush.msra.mxu0 %v3502_v25  ;;  %2307 = vmatpush.msra.mxu3 %v3504_v52 }
 0x293   :  { %2430 = vpow2.f32 %v1672_v6  ;;  %v1654_v19 = vadd.f32 %v1653_v3, %v1613_v39  ;;  %v1723_v28 = vand.u32 4294901760, %v1722_v18  ;;  %v1727_v27 = vand.u32 4294901760, %v1683_v13 }
 0x294   :  { %2161 = vmatpush.msra.mxu0 %v3512_v45 }
 0x295   :  { %v1660_v40 = vmax.f32 %v3598_v53, %v1654_v19  ;;  %1724 = vmatmul.f32.gmra.mxu0 %v1723_v28  ;;  %1797 = vmatmul.f32.gmra.mxu1 %v1727_v27  ;;  %v1728_v51 = vsub.f32 %v1683_v13, %v1727_v27 }
 0x297   :  { %v1665_v48 = vsub.f32 %v3444_v24, %v1660_v40  ;;  %1845 = vmatmul.f32.gmra.mxu2 %v1728_v51  ;;  %v1729_v59 = vand.u32 4294901760, %v1728_v51 }
 0x299   :  { %v3660_v12 = vpop.eup %2430  ;;  %v1674_v25 = vmul.f32 1.442695, %v1665_v48  ;;  %1894 = vmatmul.f32.gmra.mxu3 %v1729_v59  ;;  %v1730_v52 = vsub.f32 %v1728_v51, %v1729_v59 }
 0x29a   :  { %v1686_v35 = vsel %vm997_vm0, %v3660_v12, 0 }
 0x29b   :  { %2432 = vpow2.f32 %v1674_v25  ;;  %v1731_v16 = vand.u32 4294901760, %v1730_v52  ;;  %v1735_v45 = vand.u32 4294901760, %v1686_v35 }
 0x29d   :  { %1732 = vmatmul.f32.gmra.mxu0 %v1731_v16  ;;  %1801 = vmatmul.f32.gmra.mxu1 %v1735_v45  ;;  %v1736_v53 = vsub.f32 %v1686_v35, %v1735_v45 }
 0x29f   :  { %1850 = vmatmul.f32.gmra.mxu2 %v1736_v53  ;;  %v1737_v15 = vand.u32 4294901760, %v1736_v53 }
 0x2a1   :  { %v3664_v50 = vpop.eup %2432  ;;  %1900 = vmatmul.f32.gmra.mxu3 %v1737_v15  ;;  %v1738_v24 = vsub.f32 %v1736_v53, %v1737_v15 }
 0x2a2   :  { %v1689_v23 = vsel %vm997_vm0, %v3664_v50, 0 }
 0x2a3   :  { %v1739_v47 = vand.u32 4294901760, %v1738_v24  ;;  %v1743_v10 = vand.u32 4294901760, %v1689_v23 }
 0x2a5   :  { %1740 = vmatmul.f32.gmra.mxu0 %v1739_v47  ;;  %1805 = vmatmul.f32.gmra.mxu1 %v1743_v10  ;;  %v1744_v26 = vsub.f32 %v1689_v23, %v1743_v10 }
 0x2a7   :  { %1855 = vmatmul.f32.gmra.mxu2 %v1744_v26  ;;  %v1745_v9 = vand.u32 4294901760, %v1744_v26 }
 0x2a9   :  { %1906 = vmatmul.f32.gmra.mxu3 %v1745_v9  ;;  %v1746_v63 = vsub.f32 %v1744_v26, %v1745_v9 }
 0x2ab   :  { %v1747_v21 = vand.u32 4294901760, %v1746_v63 }
 0x2ad   :  { %1748 = vmatmul.f32.gmra.mxu0 %v1747_v21  ;;  %1980 = vmatmul.f32.vlgmr.msrb.gmra.mxu1 %v3622_v11 }
 0x2b5   :  { %1939 = vmatmul.f32.vlgmr.msrb.gmra.mxu0 %v3622_v11  ;;  %1984 = vmatmul.f32.gmra.mxu1 %v3637_v2 }
 0x2bd   :  { %1943 = vmatmul.f32.gmra.mxu0 %v3637_v2  ;;  %1988 = vmatmul.f32.gmra.mxu1 %v1727_v27 }
 0x2c5   :  { %1947 = vmatmul.f32.gmra.mxu0 %v1727_v27  ;;  %1992 = vmatmul.f32.gmra.mxu1 %v1735_v45 }
 0x2cd   :  { %1951 = vmatmul.f32.gmra.mxu0 %v1735_v45  ;;  %1996 = vmatmul.f32.gmra.mxu1 %v1743_v10 }
 0x2d5   :  { %1955 = vmatmul.f32.gmra.mxu0 %v1743_v10 }
 0x302   :  { %v1790_v41 = vpop.f32.mrf.mxu1 }
 0x30a   :  { %v1717_v4 = vpop.f32.mrf.mxu0  ;;  %v1794_v46 = vpop.f32.mrf.mxu1 }
 0x30b   :  { %v1836_v11 = vpop.f32.mrf.mxu2  ;;  %v1791_v5 = vadd.f32 %v1790_v41, %v1717_v4 }
 0x30c   :  { %v1883_v33 = vpop.f32.mrf.mxu3 }
 0x30d   :  { %v1837_v61 = vadd.f32 %v1836_v11, %v1791_v5 }
 0x30f   :  { %v1884_v1 = vadd.f32 %v1883_v33, %v1837_v61 }
 0x312   :  { %v1725_v30 = vpop.f32.mrf.mxu0  ;;  %v1798_v49 = vpop.f32.mrf.mxu1 }
 0x313   :  { %v1841_v60 = vpop.f32.mrf.mxu2  ;;  %v1795_v44 = vadd.f32 %v1794_v46, %v1725_v30 }
 0x314   :  { %v1889_v29 = vpop.f32.mrf.mxu3 }
 0x315   :  { %v1842_v0 = vadd.f32 %v1841_v60, %v1795_v44 }
 0x317   :  { %v1890_v58 = vadd.f32 %v1889_v29, %v1842_v0 }
 0x31a   :  { %v1733_v57 = vpop.f32.mrf.mxu0  ;;  %v1802_v42 = vpop.f32.mrf.mxu1 }
 0x31b   :  { %v1846_v20 = vpop.f32.mrf.mxu2  ;;  %v1799_v22 = vadd.f32 %v1798_v49, %v1733_v57 }
 0x31c   :  { %v1895_v6 = vpop.f32.mrf.mxu3 }
 0x31d   :  { %v1847_v18 = vadd.f32 %v1846_v20, %v1799_v22 }
 0x31f   :  { %v1896_v40 = vadd.f32 %v1895_v6, %v1847_v18 }
 0x322   :  { %v1741_v56 = vpop.f32.mrf.mxu0  ;;  %v1806_v62 = vpop.f32.mrf.mxu1 }
 0x323   :  { %v1803_v51 = vadd.f32 %v1802_v42, %v1741_v56  ;;  %v1851_v59 = vpop.f32.mrf.mxu2 }
 0x324   :  { %v1901_v24 = vpop.f32.mrf.mxu3 }
 0x325   :  { %v1852_v53 = vadd.f32 %v1851_v59, %v1803_v51 }
 0x327   :  { %v1902_v26 = vadd.f32 %v1901_v24, %v1852_v53 }
 0x32a   :  { %v1749_v43 = vpop.f32.mrf.mxu0  ;;  %v1981_v8 = vpop.f32.mrf.mxu1 }
 0x32b   :  { %v1807_v9 = vadd.f32 %v1806_v62, %v1749_v43  ;;  %v1856_v49 = vpop.f32.mrf.mxu2 }
 0x32c   :  { %v1907_v62 = vpop.f32.mrf.mxu3 }
 0x32d   :  { %v1857_v42 = vadd.f32 %v1856_v49, %v1807_v9 }
 0x32f   :  { %v1908_v43 = vadd.f32 %v1907_v62, %v1857_v42 }
 0x332   :  { %v1940_v31 = vpop.f32.mrf.mxu0  ;;  %v1985_v7 = vpop.f32.mrf.mxu1 }
 0x333   :  { %v1941_v17 = vadd.f32 %v1940_v31, %v1884_v1 }
 0x335   :  { %v1982_v37 = vadd.f32 %v1981_v8, %v1941_v17 }
 0x337   :  { %v3673_v2 = vadd.f32 %v3618_v38, %v1982_v37 }
 0x339   :  { %v2006_v54 = vsel %vm997_vm0, %v3673_v2, 0 }
 0x33a   :  { %v3677_v55 = vand.u32 4294901760, %v2006_v54  ;;  %v1944_v32 = vpop.f32.mrf.mxu0  ;;  %v1989_v27 = vpop.f32.mrf.mxu1 }
 0x33b   :  { %v1945_v36 = vadd.f32 %v1944_v32, %v1890_v58 }
 0x33c   :  { %v2041_v39 = vsub.f32 %v2006_v54, %v3677_v55  ;;  %2118 = vmatmul.f32.vlgmr.msrb.gmra.mxu3 %v3677_v55 }
 0x33d   :  { %v1986_v3 = vadd.f32 %v1985_v7, %v1945_v36 }
 0x33e   :  { %v2042_v13 = vand.u32 4294901760, %v2041_v39  ;;  %2164 = vmatmul.f32.vlgmr.msra.gmra.mxu0 %v2041_v39 }
 0x33f   :  { %v3682_v19 = vadd.f32 %v3631_v14, %v1986_v3 }
 0x340   :  { %v2043_v28 = vsub.f32 %v2041_v39, %v2042_v13  ;;  %2211 = vmatmul.f32.vlgmr.msra.gmra.mxu1 %v2042_v13 }
 0x341   :  { %v2009_v48 = vsel %vm997_vm0, %v3682_v19, 0 }
 0x342   :  { %v1948_v25 = vpop.f32.mrf.mxu0  ;;  %v2044_v52 = vand.u32 4294901760, %v2043_v28  ;;  %v3686_v35 = vand.u32 4294901760, %v2009_v48  ;;  %v1993_v21 = vpop.f32.mrf.mxu1 }
 0x343   :  { %v1949_v16 = vadd.f32 %v1948_v25, %v1896_v40 }
 0x344   :  { %2045 = vmatmul.f32.vlgmr.msrb.gmra.mxu2 %v2044_v52  ;;  %2122 = vmatmul.f32.gmra.mxu3 %v3686_v35  ;;  %v2049_v45 = vsub.f32 %v2009_v48, %v3686_v35 }
 0x345   :  { %v1990_v15 = vadd.f32 %v1989_v27, %v1949_v16 }
 0x346   :  { %2169 = vmatmul.f32.gmra.mxu0 %v2049_v45  ;;  %v2050_v23 = vand.u32 4294901760, %v2049_v45 }
 0x347   :  { %v3691_v47 = vadd.f32 %v3651_v34, %v1990_v15 }
 0x348   :  { %2217 = vmatmul.f32.gmra.mxu1 %v2050_v23  ;;  %v2051_v10 = vsub.f32 %v2049_v45, %v2050_v23 }
 0x349   :  { %v2012_v63 = vsel %vm997_vm0, %v3691_v47, 0 }
 0x34a   :  { %v1952_v41 = vpop.f32.mrf.mxu0  ;;  %v2052_v4 = vand.u32 4294901760, %v2051_v10  ;;  %v2056_v46 = vand.u32 4294901760, %v2012_v63  ;;  %v1997_v29 = vpop.f32.mrf.mxu1 }
 0x34b   :  { %v1953_v30 = vadd.f32 %v1952_v41, %v1902_v26 }
 0x34c   :  { %2053 = vmatmul.f32.gmra.mxu2 %v2052_v4  ;;  %2126 = vmatmul.f32.gmra.mxu3 %v2056_v46  ;;  %v2057_v57 = vsub.f32 %v2012_v63, %v2056_v46 }
 0x34d   :  { %v1994_v56 = vadd.f32 %v1993_v21, %v1953_v30 }
 0x34e   :  { %2174 = vmatmul.f32.gmra.mxu0 %v2057_v57  ;;  %v2058_v11 = vand.u32 4294901760, %v2057_v57 }
 0x34f   :  { %v3696_v33 = vadd.f32 %v3660_v12, %v1994_v56 }
 0x350   :  { %2223 = vmatmul.f32.gmra.mxu1 %v2058_v11  ;;  %v2059_v5 = vsub.f32 %v2057_v57, %v2058_v11 }
 0x351   :  { %v2015_v8 = vsel %vm997_vm0, %v3696_v33, 0 }
 0x352   :  { %v1956_v61 = vpop.f32.mrf.mxu0  ;;  %v2060_v60 = vand.u32 4294901760, %v2059_v5  ;;  %v2064_v1 = vand.u32 4294901760, %v2015_v8 }
 0x353   :  { %v1957_v44 = vadd.f32 %v1956_v61, %v1908_v43 }
 0x354   :  { %2061 = vmatmul.f32.gmra.mxu2 %v2060_v60  ;;  %2130 = vmatmul.f32.gmra.mxu3 %v2064_v1  ;;  %v2065_v31 = vsub.f32 %v2015_v8, %v2064_v1 }
 0x355   :  { %v1998_v17 = vadd.f32 %v1997_v29, %v1957_v44 }
 0x356   :  { %2179 = vmatmul.f32.gmra.mxu0 %v2065_v31  ;;  %v2066_v0 = vand.u32 4294901760, %v2065_v31 }
 0x357   :  { %v3701_v37 = vadd.f32 %v3664_v50, %v1998_v17 }
 0x358   :  { %2229 = vmatmul.f32.gmra.mxu1 %v2066_v0  ;;  %v2067_v7 = vsub.f32 %v2065_v31, %v2066_v0 }
 0x359   :  { %v2018_v20 = vsel %vm997_vm0, %v3701_v37, 0 }
 0x35a   :  { %v2068_v58 = vand.u32 4294901760, %v2067_v7  ;;  %v2072_v22 = vand.u32 4294901760, %v2018_v20 }
 0x35c   :  { %2069 = vmatmul.f32.gmra.mxu2 %v2068_v58  ;;  %2134 = vmatmul.f32.gmra.mxu3 %v2072_v22  ;;  %v2073_v54 = vsub.f32 %v2018_v20, %v2072_v22 }
 0x35e   :  { %2184 = vmatmul.f32.gmra.mxu0 %v2073_v54  ;;  %v2074_v32 = vand.u32 4294901760, %v2073_v54 }
 0x360   :  { %2235 = vmatmul.f32.gmra.mxu1 %v2074_v32  ;;  %v2075_v36 = vsub.f32 %v2073_v54, %v2074_v32 }
 0x362   :  { %v2076_v6 = vand.u32 4294901760, %v2075_v36 }
 0x364   :  { %2077 = vmatmul.f32.gmra.mxu2 %v2076_v6  ;;  %2309 = vmatmul.f32.vlgmr.msra.gmra.mxu3 %v3677_v55 }
 0x36c   :  { %2268 = vmatmul.f32.vlgmr.msra.gmra.mxu2 %v3677_v55  ;;  %2313 = vmatmul.f32.gmra.mxu3 %v3686_v35 }
 0x374   :  { %2272 = vmatmul.f32.gmra.mxu2 %v3686_v35  ;;  %2317 = vmatmul.f32.gmra.mxu3 %v2056_v46 }
 0x37c   :  { %2276 = vmatmul.f32.gmra.mxu2 %v2056_v46  ;;  %2321 = vmatmul.f32.gmra.mxu3 %v2064_v1 }
 0x384   :  { %2280 = vmatmul.f32.gmra.mxu2 %v2064_v1  ;;  %2325 = vmatmul.f32.gmra.mxu3 %v2072_v22 }
 0x38c   :  { %2284 = vmatmul.f32.gmra.mxu2 %v2072_v22 }
 0x3bb   :  { %v2165_v55 = vpop.f32.mrf.mxu0 }
 0x3bd   :  { %v2212_v59 = vpop.f32.mrf.mxu1 }
 0x3bf   :  { %v2119_v39 = vpop.f32.mrf.mxu3 }
 0x3c3   :  { %v2170_v45 = vpop.f32.mrf.mxu0 }
 0x3c5   :  { %v2218_v24 = vpop.f32.mrf.mxu1 }
 0x3c7   :  { %v2046_v18 = vpop.f32.mrf.mxu2  ;;  %v2123_v3 = vpop.f32.mrf.mxu3 }
 0x3c8   :  { %v2120_v25 = vadd.f32 %v2119_v39, %v2046_v18 }
 0x3ca   :  { %v2166_v16 = vadd.f32 %v2165_v55, %v2120_v25 }
 0x3cb   :  { %v2175_v41 = vpop.f32.mrf.mxu0 }
 0x3cc   :  { %v2213_v15 = vadd.f32 %v2212_v59, %v2166_v16 }
 0x3cd   :  { %v2224_v57 = vpop.f32.mrf.mxu1 }
 0x3cf   :  { %v2054_v13 = vpop.f32.mrf.mxu2  ;;  %v2127_v28 = vpop.f32.mrf.mxu3 }
 0x3d0   :  { %v2124_v53 = vadd.f32 %v2123_v3, %v2054_v13 }
 0x3d2   :  { %v2171_v26 = vadd.f32 %v2170_v45, %v2124_v53 }
 0x3d3   :  { %v2180_v60 = vpop.f32.mrf.mxu0 }
 0x3d4   :  { %v2219_v46 = vadd.f32 %v2218_v24, %v2171_v26 }
 0x3d5   :  { %v2230_v20 = vpop.f32.mrf.mxu1 }
 0x3d7   :  { %v2062_v27 = vpop.f32.mrf.mxu2  ;;  %v2131_v40 = vpop.f32.mrf.mxu3 }
 0x3d8   :  { %v2128_v4 = vadd.f32 %v2127_v28, %v2062_v27 }
 0x3da   :  { %v2176_v42 = vadd.f32 %v2175_v41, %v2128_v4 }
 0x3db   :  { %v2185_v55 = vpop.f32.mrf.mxu0 }
 0x3dc   :  { %v2225_v61 = vadd.f32 %v2224_v57, %v2176_v42 }
 0x3dd   :  { %v2236_v45 = vpop.f32.mrf.mxu1 }
 0x3df   :  { %v2070_v51 = vpop.f32.mrf.mxu2  ;;  %v2135_v48 = vpop.f32.mrf.mxu3 }
 0x3e0   :  { %v2132_v8 = vadd.f32 %v2131_v40, %v2070_v51 }
 0x3e2   :  { %v2181_v0 = vadd.f32 %v2180_v60, %v2132_v8 }
 0x3e4   :  { %v2231_v18 = vadd.f32 %v2230_v20, %v2181_v0 }
 0x3e7   :  { %v2078_v52 = vpop.f32.mrf.mxu2  ;;  %v2310_v35 = vpop.f32.mrf.mxu3 }
 0x3e8   :  { %v2136_v6 = vadd.f32 %v2135_v48, %v2078_v52 }
 0x3ea   :  { %v2186_v48 = vadd.f32 %v2185_v55, %v2136_v6 }
 0x3ef   :  { %v2269_v23 = vpop.f32.mrf.mxu2  ;;  %v2314_v63 = vpop.f32.mrf.mxu3 }
 0x3f0   :  { %v2270_v10 = vadd.f32 %v2269_v23, %v2213_v15  ;;  %v2237_v23 = vadd.f32 %v2236_v45, %v2186_v48 }
 0x3f2   :  { %v2311_v9 = vadd.f32 %v2310_v35, %v2270_v10 }
 0x3f4   :  { %v2329_v21 = vadd.f32 %v2311_v9, %v3673_v2 }
 0x3f6   :  { %2434 = vrcp.f32 %v2329_v21  ;;  %v2345_v44 = vand.u32 2147483648, %v2329_v21  ;;  %v2343_v17 = vand.u32 2147483647, %v2329_v21  ;;  %vm2339_vm2 = vweird.f32 %v2329_v21 }
 0x3f7   :  { %v2273_v30 = vpop.f32.mrf.mxu2  ;;  %v2318_v43 = vpop.f32.mrf.mxu3 }
 0x3f8   :  { %v2274_v49 = vadd.f32 %v2273_v30, %v2219_v46  ;;  %vm2344_vm4 = vcmp.eq.f32.partialorder %v2343_v17, 8.507059e+37 }
 0x3fa   :  { %v2315_v56 = vadd.f32 %v2314_v63, %v2274_v49 }
 0x3fc   :  { %v2435_v11 = vpop.eup %2434  ;;  %v2330_v62 = vadd.f32 %v2315_v56, %v3682_v19  ;;  %v2346_v19 = vor.u32 1.1754944e-38, %v2345_v44 }
 0x3fd   :  { %v2335_v5 = vmul.f32 %v2435_v11, %v2329_v21  ;;  %vm2340_vm1 = vweird.f32 %v2435_v11 }
 0x3fe   :  { %2436 = vrcp.f32 %v2330_v62  ;;  %vm2341_vm3 = vmor %vm2339_vm2, %vm2340_vm1  ;;  %v2360_v40 = vand.u32 2147483648, %v2330_v62  ;;  %v2358_v59 = vand.u32 2147483647, %v2330_v62  ;;  %vm2354_vm6 = vweird.f32 %v2330_v62 }
 0x3ff   :  { %v2336_v1 = vsub.f32 1.0, %v2335_v5  ;;  %v2277_v2 = vpop.f32.mrf.mxu2  ;;  %v2322_v28 = vpop.f32.mrf.mxu3 }
 0x400   :  { %v2278_v29 = vadd.f32 %v2277_v2, %v2225_v61  ;;  %vm2359_vm8 = vcmp.eq.f32.partialorder %v2358_v59, 8.507059e+37 }
 0x401   :  { %v2337_v31 = vmul.f32 %v2435_v11, %v2336_v1 }
 0x402   :  { %v2319_v7 = vadd.f32 %v2318_v43, %v2278_v29 }
 0x403   :  { %v2338_v58 = vadd.f32 %v2435_v11, %v2337_v31 }
 0x404   :  { %v2437_v22 = vpop.eup %2436  ;;  %v2331_v54 = vadd.f32 %v2319_v7, %v3691_v47 }
 0x405   :  { %v2342_v32 = vsel %vm2341_vm3, %v2435_v11, %v2338_v58  ;;  %v2350_v36 = vmul.f32 %v2437_v22, %v2330_v62  ;;  %vm2355_vm5 = vweird.f32 %v2437_v22 }
 0x406   :  { %v2347_v39 = vsel %vm2344_vm4, %v2346_v19, %v2342_v32  ;;  %2438 = vrcp.f32 %v2331_v54  ;;  %vm2356_vm7 = vmor %vm2354_vm6, %vm2355_vm5  ;;  %v2375_v63 = vand.u32 2147483648, %v2331_v54  ;;  %vm2369_vm10 = vweird.f32 %v2331_v54 }
 0x407   :  { %v2348_v3 = vmul.f32 %v3618_v38, %v2347_v39  ;;  %v2351_v13 = vsub.f32 1.0, %v2350_v36  ;;  %v2281_v27 = vpop.f32.mrf.mxu2  ;;  %v2361_v38 = vor.u32 1.1754944e-38, %v2360_v40  ;;  %v2326_v4 = vpop.f32.mrf.mxu3  ;;  %vm2413_vm6 = vcmask 259072  }
 0x408   :  { %v2282_v51 = vadd.f32 %v2281_v27, %v2231_v18  ;;  %v2376_v57 = vor.u32 1.1754944e-38, %v2375_v63 }
 0x409   :  { %2409 = vst.msk [vmem:[%s3742_s4] sm:$0xff] %vm997_vm0, %v2348_v3  ;;  %v2352_v47 = vmul.f32 %v2437_v22, %v2351_v13 }
 0x40a   :  { %v2323_v25 = vadd.f32 %v2322_v28, %v2282_v51 }
 0x40b   :  { %v2353_v52 = vadd.f32 %v2437_v22, %v2352_v47 }
 0x40c   :  { %v2439_v35 = vpop.eup %2438  ;;  %v2332_v16 = vadd.f32 %v2323_v25, %v3696_v33  ;;  %v2373_v33 = vand.u32 2147483647, %v2331_v54 }
 0x40d   :  { %v2357_v53 = vsel %vm2356_vm7, %v2437_v22, %v2353_v52  ;;  %v2365_v15 = vmul.f32 %v2439_v35, %v2331_v54  ;;  %vm2370_vm9 = vweird.f32 %v2439_v35 }
 0x40e   :  { %v2362_v24 = vsel %vm2359_vm8, %v2361_v38, %v2357_v53  ;;  %2440 = vrcp.f32 %v2332_v16  ;;  %vm2371_vm11 = vmor %vm2369_vm10, %vm2370_vm9  ;;  %vm2374_vm12 = vcmp.eq.f32.partialorder %v2373_v33, 8.507059e+37  ;;  %v2390_v43 = vand.u32 2147483648, %v2332_v16 }
 0x40f   :  { %v2363_v10 = vmul.f32 %v3631_v14, %v2362_v24  ;;  %v2366_v26 = vsub.f32 1.0, %v2365_v15  ;;  %v2285_v9 = vpop.f32.mrf.mxu2  ;;  %v2388_v61 = vand.u32 2147483647, %v2332_v16  ;;  %vm2384_vm14 = vweird.f32 %v2332_v16 }
 0x410   :  { %v2286_v21 = vadd.f32 %v2285_v9, %v2237_v23  ;;  %v2391_v1 = vor.u32 1.1754944e-38, %v2390_v43 }
 0x411   :  { %2410 = vst.msk [vmem:[%s3742_s4 + $0x8] sm:$0xff] %vm997_vm0, %v2363_v10  ;;  %v2367_v41 = vmul.f32 %v2439_v35, %v2366_v26  ;;  %vm2389_vm1 = vcmp.eq.f32.partialorder %v2388_v61, 8.507059e+37 }
 0x412   :  { %v2327_v46 = vadd.f32 %v2326_v4, %v2286_v21 }
 0x413   :  { %v2368_v30 = vadd.f32 %v2439_v35, %v2367_v41 }
 0x414   :  { %v2441_v49 = vpop.eup %2440  ;;  %v2333_v14 = vadd.f32 %v2327_v46, %v3701_v37 }
 0x415   :  { %v2372_v42 = vsel %vm2371_vm11, %v2439_v35, %v2368_v30  ;;  %v2380_v56 = vmul.f32 %v2441_v49, %v2332_v16  ;;  %vm2385_vm13 = vweird.f32 %v2441_v49 }
 0x416   :  { %v2377_v11 = vsel %vm2374_vm12, %v2376_v57, %v2372_v42  ;;  %2442 = vrcp.f32 %v2333_v14  ;;  %vm2386_vm15 = vmor %vm2384_vm14, %vm2385_vm13  ;;  %v2405_v17 = vand.u32 2147483648, %v2333_v14  ;;  %v2403_v7 = vand.u32 2147483647, %v2333_v14 }
 0x417   :  { %v2378_v62 = vmul.f32 %v3651_v34, %v2377_v11  ;;  %v2381_v5 = vsub.f32 1.0, %v2380_v56  ;;  %vm2399_vm3 = vweird.f32 %v2333_v14 }
 0x418   :  { %v2406_v58 = vor.u32 1.1754944e-38, %v2405_v17  ;;  %vm2404_vm5 = vcmp.eq.f32.partialorder %v2403_v7, 8.507059e+37 }
 0x419   :  { %2411 = vst.msk [vmem:[%s3742_s4 + $0x10] sm:$0xff] %vm997_vm0, %v2378_v62  ;;  %v2382_v8 = vmul.f32 %v2441_v49, %v2381_v5 }
 0x41b   :  { %v2383_v60 = vadd.f32 %v2441_v49, %v2382_v8 }
 0x41c   :  { %v2443_v37 = vpop.eup %2442 }
 0x41d   :  { %v2387_v2 = vsel %vm2386_vm15, %v2441_v49, %v2383_v60  ;;  %v2395_v44 = vmul.f32 %v2443_v37, %v2333_v14  ;;  %vm2400_vm2 = vweird.f32 %v2443_v37 }
 0x41e   :  { %v2392_v29 = vsel %vm2389_vm1, %v2391_v1, %v2387_v2  ;;  %vm2401_vm4 = vmor %vm2399_vm3, %vm2400_vm2 }
 0x41f   :  { %v2393_v34 = vmul.f32 %v3660_v12, %v2392_v29  ;;  %v2396_v31 = vsub.f32 1.0, %v2395_v44 }
 0x421   :  { %2412 = vst.msk [vmem:[%s3742_s4 + $0x18] sm:$0xff] %vm997_vm0, %v2393_v34  ;;  %v2397_v0 = vmul.f32 %v2443_v37, %v2396_v31 }
 0x423   :  { %v2398_v20 = vadd.f32 %v2443_v37, %v2397_v0 }
 0x425   :  { %v2402_v22 = vsel %vm2401_vm4, %v2443_v37, %v2398_v20 }
 0x426   :  { %v2407_v19 = vsel %vm2404_vm5, %v2406_v58, %v2402_v22 }
 0x427   :  { %v2408_v12 = vmul.f32 %v3664_v50, %v2407_v19 }
 0x429   :  { %2414 = vst.msk [vmem:[%s3742_s4 + $0x20] sm:$0x3f] %vm2413_vm6, %v2408_v12 }

</bundles_post_ra>
